<compile_context>
chip_gen: v7x
topology: tpu7x:2x2x1
jax: 0.10.0
libtpu: 0.0.40
codegen_flags: <defaults>
</compile_context>

<pallas_src>
import functools
import math

import jax
import jax.numpy as jnp
from jax.experimental import pallas as pl
from jax.experimental.pallas import tpu as pltpu


def _round_up(x, m):
    return (x + m - 1) // m * m


def _graph_transformer_kernel(
    # static config (via functools.partial)
    num_heads, head_dim, out_channels,
    # refs
    x_ref, adj_ref,
    wqkv_ref, bqkv_ref, wo_ref, bo_ref, wp_ref, bp_ref,
    g1_ref, beta1_ref, g2_ref, beta2_ref,
    wf1_ref, bf1_ref, wf2_ref, bf2_ref,
    out_ref,
):
    H, D, C = num_heads, head_dim, out_channels
    n_pad, c_in = x_ref.shape           # padded node count, input channels
    cp = out_ref.shape[1]               # lane-padded output channels (multiple of 128)

    x_bf = x_ref[...]                   # (Np, Cin) bf16
    keep = adj_ref[...] != 0            # (Np, Np) bool  -- computed once (hoisted mask)

    # ---- fused QKV projection: single leading-batch dot_general over 3*H "heads" ----
    xb = jnp.broadcast_to(x_bf, (3 * H, n_pad, c_in))                       # (3H, Np, Cin)
    qkv = (
        jnp.einsum("bnc,bcd->bnd", xb, wqkv_ref[...],
                   preferred_element_type=jnp.float32)
        + bqkv_ref[...]                                                      # (3H, 1, D) bias
    )                                                                        # (3H, Np, D) f32
    q = qkv[0:H].astype(jnp.bfloat16)                                        # (H, Np, D)
    k = qkv[H:2 * H].astype(jnp.bfloat16)
    v = qkv[2 * H:3 * H].astype(jnp.bfloat16)

    # ---- head-batched attention ----
    scale = jnp.float32(1.0 / math.sqrt(float(D)))
    s = jnp.einsum("hnd,hmd->hnm", q, k,
                   preferred_element_type=jnp.float32) * scale               # (H, Np, Np)
    s = jnp.where(keep[None, :, :], s, -jnp.inf)                             # keep edges only

    m = jnp.max(s, axis=-1, keepdims=True)
    m = jnp.where(m > -jnp.inf, m, 0.0)            # guard fully-masked rows
    e = jnp.exp(s - m)                             # masked / empty entries -> exactly 0
    rs = jnp.sum(e, axis=-1, keepdims=True)
    denom = jnp.where(rs > 0.0, rs, 1.0)           # empty rows -> p == 0 (torch nan_to_num)
    p = e * pl.reciprocal(denom, approx=True)      # divide on the EUP

    attn = jnp.einsum("hnm,hmd->hnd", p.astype(jnp.bfloat16), v,
                      preferred_element_type=jnp.float32)                    # (H, Np, D)

    # ---- W_o applied per head and reduced over heads (no concat / transpose) ----
    attn_o = jnp.einsum("hnd,hdc->hnc", attn.astype(jnp.bfloat16), wo_ref[...],
                        preferred_element_type=jnp.float32)                  # (H, Np, Cp)
    attn_o = jnp.sum(attn_o, axis=0) + bo_ref[...]                           # (Np, Cp)

    x_proj = (jnp.dot(x_bf, wp_ref[...], preferred_element_type=jnp.float32)
              + bp_ref[...])                                                 # (Np, Cp)

    # ---- LayerNorm over the real C channels of lane-padded rows (pad lanes are zero) ----
    cmask = (jax.lax.broadcasted_iota(jnp.int32, (1, cp), 1) < C).astype(jnp.float32)
    inv_c = jnp.float32(1.0 / C)

    def layer_norm(z, g, b):
        mu = jnp.sum(z, axis=-1, keepdims=True) * inv_c
        zc = (z - mu) * cmask
        var = jnp.sum(zc * zc, axis=-1, keepdims=True) * inv_c
        zn = zc * jax.lax.rsqrt(var + jnp.float32(1e-5))
        return zn * g + b              # padded gamma/beta are zero -> pad lanes stay zero

    y1 = layer_norm(x_proj + attn_o, g1_ref[...], beta1_ref[...])

    # ---- FFN: Linear -> GELU(exact, erf) -> Linear ; dropout == identity (eval) ----
    f = (jnp.dot(y1.astype(jnp.bfloat16), wf1_ref[...],
                 preferred_element_type=jnp.float32) + bf1_ref[...])
    f = 0.5 * f * (1.0 + jax.lax.erf(f * jnp.float32(1.0 / math.sqrt(2.0))))
    f = (jnp.dot(f.astype(jnp.bfloat16), wf2_ref[...],
                 preferred_element_type=jnp.float32) + bf2_ref[...])

    y2 = layer_norm(y1 + f, g2_ref[...], beta2_ref[...])
    out_ref[...] = y2.astype(out_ref.dtype)


def graph_transformer_layer(x, edge_list, params, num_heads):
    """x: (N, Cin) float32, edge_list: (2, E) int32 directed edges."""
    N, Cin = x.shape
    C = params["wq"].shape[0]
    if C % num_heads != 0:
        raise ValueError("num_heads must divide out_channels")
    H = num_heads
    D = C // H

    LANE, SUB = 128, 8
    Np = _round_up(N, SUB)
    Cp = _round_up(C, LANE)
    F = 2 * C
    Fp = _round_up(F, LANE)

    f32, bf16 = jnp.float32, jnp.bfloat16

    # ---- dense int8 adjacency (with self loops), as in the torch forward (setup glue) ----
    adj = jnp.zeros((N, N), jnp.int8)
    adj = adj.at[edge_list[0], edge_list[1]].set(1)
    adj = adj.at[jnp.arange(N), jnp.arange(N)].set(1)

    # ---- host-side weight repacking: transpose to (in, out), group per head, pad lanes ----
    def pad2(a, shape):
        return jnp.zeros(shape, a.dtype).at[:a.shape[0], :a.shape[1]].set(a)

    def head_w(w):   # torch (C, Cin) -> (H, Cin, D)
        return jnp.transpose(w.reshape(H, D, Cin), (0, 2, 1))

    def head_b(b):   # (C,) -> (H, 1, D)
        return b.reshape(H, 1, D)

    wqkv = jnp.concatenate(
        [head_w(params["wq"]), head_w(params["wk"]), head_w(params["wv"])], axis=0
    ).astype(bf16)                                                    # (3H, Cin, D)
    bqkv = jnp.concatenate(
        [head_b(params["bq"]), head_b(params["bk"]), head_b(params["bv"])], axis=0
    ).astype(f32)                                                     # (3H, 1, D)

    # W_o: torch (C, C); input rows grouped per head, output cols lane-padded.
    wo = params["wo"].T.reshape(H, D, C)
    wo = jnp.zeros((H, D, Cp), f32).at[:, :, :C].set(wo).astype(bf16)  # (H, D, Cp)
    bo = jnp.zeros((1, Cp), f32).at[0, :C].set(params["bo"])

    wp = pad2(params["wp"].T, (Cin, Cp)).astype(bf16)                  # input_proj
    bp = jnp.zeros((1, Cp), f32).at[0, :C].set(params["bp"])

    wf1 = pad2(params["wf1"].T, (Cp, Fp)).astype(bf16)
    bf1_ = jnp.zeros((1, Fp), f32).at[0, :F].set(params["bf1"])
    wf2 = pad2(params["wf2"].T, (Fp, Cp)).astype(bf16)
    bf2_ = jnp.zeros((1, Cp), f32).at[0, :C].set(params["bf2"])

    # LN params zero-padded so padded output lanes stay exactly zero.
    g1 = jnp.zeros((1, Cp), f32).at[0, :C].set(params["g1"])
    b1 = jnp.zeros((1, Cp), f32).at[0, :C].set(params["beta1"])
    g2 = jnp.zeros((1, Cp), f32).at[0, :C].set(params["g2"])
    b2 = jnp.zeros((1, Cp), f32).at[0, :C].set(params["beta2"])

    # Activations: pad N to a sublane multiple, cast x to bf16, adjacency stays int8.
    xp = jnp.zeros((Np, Cin), f32).at[:N, :].set(x).astype(bf16)
    adjp = jnp.zeros((Np, Np), jnp.int8).at[:N, :N].set(adj)

    args = (xp, adjp, wqkv, bqkv, wo, bo, wp, bp,
            g1, b1, g2, b2, wf1, bf1_, wf2, bf2_)

    vmem = pl.BlockSpec(memory_space=pltpu.MemorySpace.VMEM)
    kernel = functools.partial(_graph_transformer_kernel, H, D, C)

    out_p = pl.pallas_call(
        kernel,
        out_shape=jax.ShapeDtypeStruct((Np, Cp), jnp.float32),
        in_specs=[vmem] * len(args),
        out_specs=vmem,
    )(*args)
    return out_p[:N, :C]


def init_params(key, in_channels, out_channels):
    ks = jax.random.split(key, 10)
    s = 0.1

    def lin(k, out_d, in_d):
        kw, kb = jax.random.split(k)
        w = jax.random.normal(kw, (out_d, in_d), jnp.float32) * s
        b = jax.random.normal(kb, (out_d,), jnp.float32) * s
        return w, b

    wq, bq = lin(ks[0], out_channels, in_channels)
    wk, bk = lin(ks[1], out_channels, in_channels)
    wv, bv = lin(ks[2], out_channels, in_channels)
    wo, bo = lin(ks[3], out_channels, out_channels)
    wp, bp = lin(ks[4], out_channels, in_channels)
    wf1, bf1 = lin(ks[5], out_channels * 2, out_channels)
    wf2, bf2 = lin(ks[6], out_channels, out_channels * 2)
    return dict(
        wq=wq, bq=bq, wk=wk, bk=bk, wv=wv, bv=bv,
        wo=wo, bo=bo, wp=wp, bp=bp,
        g1=jnp.ones((out_channels,), jnp.float32),
        beta1=jnp.zeros((out_channels,), jnp.float32),
        g2=jnp.ones((out_channels,), jnp.float32),
        beta2=jnp.zeros((out_channels,), jnp.float32),
        wf1=wf1, bf1=bf1, wf2=wf2, bf2=bf2,
    )


if __name__ == "__main__":
    N = 8            # number of graph nodes
    IN_CH = 16
    OUT_CH = 32
    NUM_HEADS = 8    # head_dim = 4

    key = jax.random.PRNGKey(0)
    kx, kp = jax.random.split(key)
    x = jax.random.normal(kx, (N, IN_CH), jnp.float32)

    # deterministic small edge list (directed edges), shape (2, E)
    edge_list = jnp.array(
        [[0, 1, 2, 3, 4, 5, 6, 7, 0, 2],
         [1, 2, 3, 4, 5, 6, 7, 0, 3, 5]], dtype=jnp.int32)

    params = init_params(kp, IN_CH, OUT_CH)

    out = graph_transformer_layer(x, edge_list, params, NUM_HEADS)
    out = jax.block_until_ready(out)
    assert out.shape == (N, OUT_CH)
    assert bool(jnp.all(jnp.isfinite(out)))
    print("KERNEL_OK")
</pallas_src>

<mosaic_0001>
module attributes {stable_mosaic.version = 11 : i64} {
  func.func @_graph_transformer_kernel(%arg0: memref<8x16xbf16, #tpu.memory_space<vmem>>, %arg1: memref<8x8xi8, #tpu.memory_space<vmem>>, %arg2: memref<24x16x4xbf16, #tpu.memory_space<vmem>>, %arg3: memref<24x1x4xf32, #tpu.memory_space<vmem>>, %arg4: memref<8x4x128xbf16, #tpu.memory_space<vmem>>, %arg5: memref<1x128xf32, #tpu.memory_space<vmem>>, %arg6: memref<16x128xbf16, #tpu.memory_space<vmem>>, %arg7: memref<1x128xf32, #tpu.memory_space<vmem>>, %arg8: memref<1x128xf32, #tpu.memory_space<vmem>>, %arg9: memref<1x128xf32, #tpu.memory_space<vmem>>, %arg10: memref<1x128xf32, #tpu.memory_space<vmem>>, %arg11: memref<1x128xf32, #tpu.memory_space<vmem>>, %arg12: memref<128x128xbf16, #tpu.memory_space<vmem>>, %arg13: memref<1x128xf32, #tpu.memory_space<vmem>>, %arg14: memref<128x128xbf16, #tpu.memory_space<vmem>>, %arg15: memref<1x128xf32, #tpu.memory_space<vmem>>, %arg16: memref<8x128xf32, #tpu.memory_space<vmem>>) attributes {dimension_semantics = [], scalar_prefetch = 0 : i64, scratch_operands = 0 : i64, tpu.core_type = #tpu.core_type<tc>} {
    %c0 = arith.constant 0 : index
    %c0_0 = arith.constant 0 : index
    %0 = vector.load %arg0[%c0, %c0_0] : memref<8x16xbf16, #tpu.memory_space<vmem>>, vector<8x16xbf16>
    %c0_1 = arith.constant 0 : index
    %c0_2 = arith.constant 0 : index
    %1 = vector.load %arg1[%c0_1, %c0_2] : memref<8x8xi8, #tpu.memory_space<vmem>>, vector<8x8xi8>
    %c0_i8 = arith.constant 0 : i8
    %2 = vector.broadcast %c0_i8 : i8 to vector<8x8xi8>
    %3 = arith.cmpi ne, %1, %2 : vector<8x8xi8>
    %4 = vector.shape_cast %0 : vector<8x16xbf16> to vector<1x8x16xbf16>
    %5 = vector.broadcast %4 : vector<1x8x16xbf16> to vector<24x8x16xbf16>
    %c0_3 = arith.constant 0 : index
    %c0_4 = arith.constant 0 : index
    %c0_5 = arith.constant 0 : index
    %6 = vector.load %arg2[%c0_3, %c0_4, %c0_5] : memref<24x16x4xbf16, #tpu.memory_space<vmem>>, vector<24x16x4xbf16>
    "tpu.trace_start"() <{level = 10 : i32, message = "bnc,bcd->bnd"}> : () -> ()
    %cst = arith.constant dense<0.000000e+00> : vector<24x8x4xf32>
    %7 = tpu.matmul %5, %6, %cst {dimension_numbers = #tpu.dot_dimension_numbers<[2], [1], [1], [2], [0, 0, 0, 1, 1, 2], [0], [0]>} : vector<24x8x16xbf16>, vector<24x16x4xbf16>, vector<24x8x4xf32> -> vector<24x8x4xf32>
    "tpu.trace_stop"() : () -> ()
    %c0_6 = arith.constant 0 : index
    %c0_7 = arith.constant 0 : index
    %c0_8 = arith.constant 0 : index
    %8 = vector.load %arg3[%c0_6, %c0_7, %c0_8] : memref<24x1x4xf32, #tpu.memory_space<vmem>>, vector<24x1x4xf32>
    %9 = vector.broadcast %8 : vector<24x1x4xf32> to vector<24x8x4xf32>
    %10 = arith.addf %7, %9 : vector<24x8x4xf32>
    %11 = vector.extract_strided_slice %10 {offsets = [0, 0, 0], sizes = [8, 8, 4], strides = [1, 1, 1]} : vector<24x8x4xf32> to vector<8x8x4xf32>
    %12 = arith.truncf %11 : vector<8x8x4xf32> to vector<8x8x4xbf16>
    %13 = vector.extract_strided_slice %10 {offsets = [8, 0, 0], sizes = [8, 8, 4], strides = [1, 1, 1]} : vector<24x8x4xf32> to vector<8x8x4xf32>
    %14 = arith.truncf %13 : vector<8x8x4xf32> to vector<8x8x4xbf16>
    %15 = vector.extract_strided_slice %10 {offsets = [16, 0, 0], sizes = [8, 8, 4], strides = [1, 1, 1]} : vector<24x8x4xf32> to vector<8x8x4xf32>
    %16 = arith.truncf %15 : vector<8x8x4xf32> to vector<8x8x4xbf16>
    "tpu.trace_start"() <{level = 10 : i32, message = "hnd,hmd->hnm"}> : () -> ()
    %cst_9 = arith.constant dense<0.000000e+00> : vector<8x8x8xf32>
    %17 = tpu.matmul %12, %14, %cst_9 {dimension_numbers = #tpu.dot_dimension_numbers<[2], [2], [1], [1], [0, 0, 0, 1, 1, 1], [0], [0]>} : vector<8x8x4xbf16>, vector<8x8x4xbf16>, vector<8x8x8xf32> -> vector<8x8x8xf32>
    "tpu.trace_stop"() : () -> ()
    %cst_10 = arith.constant 5.000000e-01 : f32
    %18 = vector.broadcast %cst_10 : f32 to vector<8x8x8xf32>
    %19 = arith.mulf %17, %18 : vector<8x8x8xf32>
    %20 = vector.shape_cast %3 : vector<8x8xi1> to vector<1x8x8xi1>
    %cst_11 = arith.constant 0xFF800000 : f32
    %21 = vector.shape_cast %20 : vector<1x8x8xi1> to vector<1x8x8xi1>
    %22 = vector.broadcast %21 : vector<1x8x8xi1> to vector<8x8x8xi1>
    %23 = vector.broadcast %cst_11 : f32 to vector<8x8x8xf32>
    %24 = arith.select %22, %19, %23 : vector<8x8x8xi1>, vector<8x8x8xf32>
    %cst_12 = arith.constant dense<0xFF800000> : vector<8x8xf32>
    %25 = vector.multi_reduction <maximumf>, %24, %cst_12 [2] : vector<8x8x8xf32> to vector<8x8xf32>
    %26 = vector.shape_cast %25 : vector<8x8xf32> to vector<8x8x1xf32>
    %cst_13 = arith.constant 0xFF800000 : f32
    %27 = vector.broadcast %cst_13 : f32 to vector<8x8x1xf32>
    %28 = arith.cmpf ogt, %26, %27 : vector<8x8x1xf32>
    %cst_14 = arith.constant 0.000000e+00 : f32
    %29 = vector.broadcast %cst_14 : f32 to vector<8x8x1xf32>
    %30 = arith.select %28, %26, %29 : vector<8x8x1xi1>, vector<8x8x1xf32>
    %31 = vector.broadcast %30 : vector<8x8x1xf32> to vector<8x8x8xf32>
    %32 = arith.subf %24, %31 : vector<8x8x8xf32>
    %33 = math.exp %32 : vector<8x8x8xf32>
    %cst_15 = arith.constant dense<0.000000e+00> : vector<8x8xf32>
    %34 = vector.multi_reduction <add>, %33, %cst_15 [2] : vector<8x8x8xf32> to vector<8x8xf32>
    %35 = vector.shape_cast %34 : vector<8x8xf32> to vector<8x8x1xf32>
    %cst_16 = arith.constant 0.000000e+00 : f32
    %36 = vector.broadcast %cst_16 : f32 to vector<8x8x1xf32>
    %37 = arith.cmpf ogt, %35, %36 : vector<8x8x1xf32>
    %cst_17 = arith.constant 1.000000e+00 : f32
    %38 = vector.broadcast %cst_17 : f32 to vector<8x8x1xf32>
    %39 = arith.select %37, %35, %38 : vector<8x8x1xi1>, vector<8x8x1xf32>
    %40 = tpu.reciprocal %39 {approx = true} : vector<8x8x1xf32> -> vector<8x8x1xf32>
    %41 = vector.broadcast %40 : vector<8x8x1xf32> to vector<8x8x8xf32>
    %42 = arith.mulf %33, %41 : vector<8x8x8xf32>
    %43 = arith.truncf %42 : vector<8x8x8xf32> to vector<8x8x8xbf16>
    "tpu.trace_start"() <{level = 10 : i32, message = "hnm,hmd->hnd"}> : () -> ()
    %cst_18 = arith.constant dense<0.000000e+00> : vector<8x8x4xf32>
    %44 = tpu.matmul %43, %16, %cst_18 {dimension_numbers = #tpu.dot_dimension_numbers<[2], [1], [1], [2], [0, 0, 0, 1, 1, 2], [0], [0]>} : vector<8x8x8xbf16>, vector<8x8x4xbf16>, vector<8x8x4xf32> -> vector<8x8x4xf32>
    "tpu.trace_stop"() : () -> ()
    %45 = arith.truncf %44 : vector<8x8x4xf32> to vector<8x8x4xbf16>
    %c0_19 = arith.constant 0 : index
    %c0_20 = arith.constant 0 : index
    %c0_21 = arith.constant 0 : index
    %46 = vector.load %arg4[%c0_19, %c0_20, %c0_21] : memref<8x4x128xbf16, #tpu.memory_space<vmem>>, vector<8x4x128xbf16>
    "tpu.trace_start"() <{level = 10 : i32, message = "hnd,hdc->hnc"}> : () -> ()
    %cst_22 = arith.constant dense<0.000000e+00> : vector<8x8x128xf32>
    %47 = tpu.matmul %45, %46, %cst_22 {dimension_numbers = #tpu.dot_dimension_numbers<[2], [1], [1], [2], [0, 0, 0, 1, 1, 2], [0], [0]>} : vector<8x8x4xbf16>, vector<8x4x128xbf16>, vector<8x8x128xf32> -> vector<8x8x128xf32>
    "tpu.trace_stop"() : () -> ()
    %cst_23 = arith.constant dense<0.000000e+00> : vector<8x128xf32>
    %48 = vector.multi_reduction <add>, %47, %cst_23 [0] : vector<8x8x128xf32> to vector<8x128xf32>
    %c0_24 = arith.constant 0 : index
    %c0_25 = arith.constant 0 : index
    %49 = vector.load %arg5[%c0_24, %c0_25] : memref<1x128xf32, #tpu.memory_space<vmem>>, vector<1x128xf32>
    %50 = vector.broadcast %49 : vector<1x128xf32> to vector<8x128xf32>
    %51 = arith.addf %48, %50 : vector<8x128xf32>
    %c0_26 = arith.constant 0 : index
    %c0_27 = arith.constant 0 : index
    %52 = vector.load %arg6[%c0_26, %c0_27] : memref<16x128xbf16, #tpu.memory_space<vmem>>, vector<16x128xbf16>
    %cst_28 = arith.constant dense<0.000000e+00> : vector<8x128xf32>
    %53 = tpu.matmul %0, %52, %cst_28 {dimension_numbers = #tpu.dot_dimension_numbers<[1], [0], [0], [1], [0, 0, 1, 1], [], []>} : vector<8x16xbf16>, vector<16x128xbf16>, vector<8x128xf32> -> vector<8x128xf32>
    %c0_29 = arith.constant 0 : index
    %c0_30 = arith.constant 0 : index
    %54 = vector.load %arg7[%c0_29, %c0_30] : memref<1x128xf32, #tpu.memory_space<vmem>>, vector<1x128xf32>
    %55 = vector.broadcast %54 : vector<1x128xf32> to vector<8x128xf32>
    %56 = arith.addf %53, %55 : vector<8x128xf32>
    %57 = tpu.iota {dimensions = array<i32: 1>} : vector<1x128xi32>
    %c32_i32 = arith.constant 32 : i32
    %58 = vector.broadcast %c32_i32 : i32 to vector<1x128xi32>
    %59 = arith.cmpi slt, %57, %58 : vector<1x128xi32>
    %60 = arith.extui %59 : vector<1x128xi1> to vector<1x128xi32>
    %61 = arith.sitofp %60 : vector<1x128xi32> to vector<1x128xf32>
    %62 = arith.addf %56, %51 : vector<8x128xf32>
    %c0_31 = arith.constant 0 : index
    %c0_32 = arith.constant 0 : index
    %63 = vector.load %arg8[%c0_31, %c0_32] : memref<1x128xf32, #tpu.memory_space<vmem>>, vector<1x128xf32>
    %c0_33 = arith.constant 0 : index
    %c0_34 = arith.constant 0 : index
    %64 = vector.load %arg9[%c0_33, %c0_34] : memref<1x128xf32, #tpu.memory_space<vmem>>, vector<1x128xf32>
    %cst_35 = arith.constant dense<0.000000e+00> : vector<8xf32>
    %65 = vector.multi_reduction <add>, %62, %cst_35 [1] : vector<8x128xf32> to vector<8xf32>
    %66 = vector.shape_cast %65 : vector<8xf32> to vector<8x1xf32>
    %cst_36 = arith.constant 3.125000e-02 : f32
    %67 = vector.broadcast %cst_36 : f32 to vector<8x1xf32>
    %68 = arith.mulf %66, %67 : vector<8x1xf32>
    %69 = vector.broadcast %68 : vector<8x1xf32> to vector<8x128xf32>
    %70 = arith.subf %62, %69 : vector<8x128xf32>
    %71 = vector.broadcast %61 : vector<1x128xf32> to vector<8x128xf32>
    %72 = arith.mulf %70, %71 : vector<8x128xf32>
    %73 = arith.mulf %72, %72 : vector<8x128xf32>
    %cst_37 = arith.constant dense<0.000000e+00> : vector<8xf32>
    %74 = vector.multi_reduction <add>, %73, %cst_37 [1] : vector<8x128xf32> to vector<8xf32>
    %75 = vector.shape_cast %74 : vector<8xf32> to vector<8x1xf32>
    %cst_38 = arith.constant 3.125000e-02 : f32
    %76 = vector.broadcast %cst_38 : f32 to vector<8x1xf32>
    %77 = arith.mulf %75, %76 : vector<8x1xf32>
    %cst_39 = arith.constant 9.99999974E-6 : f32
    %78 = vector.broadcast %cst_39 : f32 to vector<8x1xf32>
    %79 = arith.addf %77, %78 : vector<8x1xf32>
    %80 = math.rsqrt %79 : vector<8x1xf32>
    %81 = vector.broadcast %80 : vector<8x1xf32> to vector<8x128xf32>
    %82 = arith.mulf %72, %81 : vector<8x128xf32>
    %83 = vector.broadcast %63 : vector<1x128xf32> to vector<8x128xf32>
    %84 = arith.mulf %82, %83 : vector<8x128xf32>
    %85 = vector.broadcast %64 : vector<1x128xf32> to vector<8x128xf32>
    %86 = arith.addf %84, %85 : vector<8x128xf32>
    %87 = arith.truncf %86 : vector<8x128xf32> to vector<8x128xbf16>
    %c0_40 = arith.constant 0 : index
    %c0_41 = arith.constant 0 : index
    %88 = vector.load %arg12[%c0_40, %c0_41] : memref<128x128xbf16, #tpu.memory_space<vmem>>, vector<128x128xbf16>
    %cst_42 = arith.constant dense<0.000000e+00> : vector<8x128xf32>
    %89 = tpu.matmul %87, %88, %cst_42 {dimension_numbers = #tpu.dot_dimension_numbers<[1], [0], [0], [1], [0, 0, 1, 1], [], []>} : vector<8x128xbf16>, vector<128x128xbf16>, vector<8x128xf32> -> vector<8x128xf32>
    %c0_43 = arith.constant 0 : index
    %c0_44 = arith.constant 0 : index
    %90 = vector.load %arg13[%c0_43, %c0_44] : memref<1x128xf32, #tpu.memory_space<vmem>>, vector<1x128xf32>
    %91 = vector.broadcast %90 : vector<1x128xf32> to vector<8x128xf32>
    %92 = arith.addf %89, %91 : vector<8x128xf32>
    %cst_45 = arith.constant 5.000000e-01 : f32
    %93 = vector.broadcast %cst_45 : f32 to vector<8x128xf32>
    %94 = arith.mulf %93, %92 : vector<8x128xf32>
    %cst_46 = arith.constant 0.707106769 : f32
    %95 = vector.broadcast %cst_46 : f32 to vector<8x128xf32>
    %96 = arith.mulf %92, %95 : vector<8x128xf32>
    %97 = math.erf %96 : vector<8x128xf32>
    %cst_47 = arith.constant 1.000000e+00 : f32
    %98 = vector.broadcast %cst_47 : f32 to vector<8x128xf32>
    %99 = arith.addf %98, %97 : vector<8x128xf32>
    %100 = arith.mulf %94, %99 : vector<8x128xf32>
    %101 = arith.truncf %100 : vector<8x128xf32> to vector<8x128xbf16>
    %c0_48 = arith.constant 0 : index
    %c0_49 = arith.constant 0 : index
    %102 = vector.load %arg14[%c0_48, %c0_49] : memref<128x128xbf16, #tpu.memory_space<vmem>>, vector<128x128xbf16>
    %cst_50 = arith.constant dense<0.000000e+00> : vector<8x128xf32>
    %103 = tpu.matmul %101, %102, %cst_50 {dimension_numbers = #tpu.dot_dimension_numbers<[1], [0], [0], [1], [0, 0, 1, 1], [], []>} : vector<8x128xbf16>, vector<128x128xbf16>, vector<8x128xf32> -> vector<8x128xf32>
    %c0_51 = arith.constant 0 : index
    %c0_52 = arith.constant 0 : index
    %104 = vector.load %arg15[%c0_51, %c0_52] : memref<1x128xf32, #tpu.memory_space<vmem>>, vector<1x128xf32>
    %105 = vector.broadcast %104 : vector<1x128xf32> to vector<8x128xf32>
    %106 = arith.addf %103, %105 : vector<8x128xf32>
    %107 = arith.addf %86, %106 : vector<8x128xf32>
    %c0_53 = arith.constant 0 : index
    %c0_54 = arith.constant 0 : index
    %108 = vector.load %arg10[%c0_53, %c0_54] : memref<1x128xf32, #tpu.memory_space<vmem>>, vector<1x128xf32>
    %c0_55 = arith.constant 0 : index
    %c0_56 = arith.constant 0 : index
    %109 = vector.load %arg11[%c0_55, %c0_56] : memref<1x128xf32, #tpu.memory_space<vmem>>, vector<1x128xf32>
    %cst_57 = arith.constant dense<0.000000e+00> : vector<8xf32>
    %110 = vector.multi_reduction <add>, %107, %cst_57 [1] : vector<8x128xf32> to vector<8xf32>
    %111 = vector.shape_cast %110 : vector<8xf32> to vector<8x1xf32>
    %cst_58 = arith.constant 3.125000e-02 : f32
    %112 = vector.broadcast %cst_58 : f32 to vector<8x1xf32>
    %113 = arith.mulf %111, %112 : vector<8x1xf32>
    %114 = vector.broadcast %113 : vector<8x1xf32> to vector<8x128xf32>
    %115 = arith.subf %107, %114 : vector<8x128xf32>
    %116 = vector.broadcast %61 : vector<1x128xf32> to vector<8x128xf32>
    %117 = arith.mulf %115, %116 : vector<8x128xf32>
    %118 = arith.mulf %117, %117 : vector<8x128xf32>
    %cst_59 = arith.constant dense<0.000000e+00> : vector<8xf32>
    %119 = vector.multi_reduction <add>, %118, %cst_59 [1] : vector<8x128xf32> to vector<8xf32>
    %120 = vector.shape_cast %119 : vector<8xf32> to vector<8x1xf32>
    %cst_60 = arith.constant 3.125000e-02 : f32
    %121 = vector.broadcast %cst_60 : f32 to vector<8x1xf32>
    %122 = arith.mulf %120, %121 : vector<8x1xf32>
    %cst_61 = arith.constant 9.99999974E-6 : f32
    %123 = vector.broadcast %cst_61 : f32 to vector<8x1xf32>
    %124 = arith.addf %122, %123 : vector<8x1xf32>
    %125 = math.rsqrt %124 : vector<8x1xf32>
    %126 = vector.broadcast %125 : vector<8x1xf32> to vector<8x128xf32>
    %127 = arith.mulf %117, %126 : vector<8x128xf32>
    %128 = vector.broadcast %108 : vector<1x128xf32> to vector<8x128xf32>
    %129 = arith.mulf %127, %128 : vector<8x128xf32>
    %130 = vector.broadcast %109 : vector<1x128xf32> to vector<8x128xf32>
    %131 = arith.addf %129, %130 : vector<8x128xf32>
    %c0_62 = arith.constant 0 : index
    %c0_63 = arith.constant 0 : index
    %132 = vector.load %arg16[%c0_62, %c0_63] : memref<8x128xf32, #tpu.memory_space<vmem>>, vector<8x128xf32>
    tpu.vector_store %arg16[%c0_62, %c0_63], %131 {strides = array<i32>} : memref<8x128xf32, #tpu.memory_space<vmem>>, vector<8x128xf32>,
    return
  }
}

</mosaic_0001>

<bundles_post_ra>
// kernel: tpu_custom_call.1
= control target key start
LH: loop header
LB: loop body
LE: loop exit
PB: predicated region body
PF: predicated region fallthrough
CT: control target
= control target key end

     0   :  { %s4501_s0 = inlined_call_operand.vmem [shape: bf16[8,16], index: 0, kind: input, shape index: {}]   ;;  %s4502_s1 = inlined_call_operand.vmem [shape: s8[8,8], index: 1, kind: input, shape index: {}]   ;;  %s4503_s2 = inlined_call_operand.vmem [shape: bf16[24,16,4], index: 2, kind: input, shape index: {}]   ;;  %s4504_s3 = inlined_call_operand.vmem [shape: f32[24,1,4], index: 3, kind: input, shape index: {}]   ;;  %s4505_s4 = inlined_call_operand.vmem [shape: bf16[8,4,128], index: 4, kind: input, shape index: {}]   ;;  %s4506_s5 = inlined_call_operand.vmem [shape: f32[1,128], index: 5, kind: input, shape index: {}]   ;;  %s4507_s6 = inlined_call_operand.vmem [shape: bf16[16,128], index: 6, kind: input, shape index: {}]   ;;  %s4508_s7 = inlined_call_operand.vmem [shape: f32[1,128], index: 7, kind: input, shape index: {}]   ;;  %s4509_s8 = inlined_call_operand.vmem [shape: f32[1,128], index: 8, kind: input, shape index: {}]   ;;  %s4510_s9 = inlined_call_operand.vmem [shape: f32[1,128], index: 9, kind: input, shape index: {}]   ;;  %s4511_s10 = inlined_call_operand.vmem [shape: f32[1,128], index: 10, kind: input, shape index: {}]   ;;  %s4512_s11 = inlined_call_operand.vmem [shape: f32[1,128], index: 11, kind: input, shape index: {}]   ;;  %s4513_s12 = inlined_call_operand.vmem [shape: bf16[128,128], index: 12, kind: input, shape index: {}]   ;;  %s4514_s13 = inlined_call_operand.vmem [shape: f32[1,128], index: 13, kind: input, shape index: {}]   ;;  %s4515_s14 = inlined_call_operand.vmem [shape: bf16[128,128], index: 14, kind: input, shape index: {}]   ;;  %s4516_s15 = inlined_call_operand.vmem [shape: f32[1,128], index: 15, kind: input, shape index: {}]   ;;  %s4517_s16 = inlined_call_operand.hbm [shape: f32[8,128], index: 16, kind: output, shape index: {}]  }
   0x1   :  { %4519 = sst [smem:[#allocation5_spill]] %s4501_s0 }
   0x2   :  { %v3669_v0 = vld [vmem:[%s4503_s2] sm:$0xff]   ;;  %v3773_v1 = vmov 0.0   ;;  %v3670_v2 = vld [vmem:[%s4503_s2 + $0x8] sm:$0xff]   ;;  %vm3774_vm0 = vmmov 0   ;;  %s4520_s27 = sld [smem:[#allocation5_spill]]  ;;  %vm282_vm1 = vcmask 130048  }
   0x3   :  { %3297 = vmatprep.subr.bf16.mxu0 %v3773_v1  ;;  %3303 = vmatprep.subr.bf16.mxu1 %v3773_v1  ;;  %v3671_v4 = vld [vmem:[%s4503_s2 + $0x10] sm:$0xff]   ;;  %v3672_v5 = vld [vmem:[%s4503_s2 + $0x18] sm:$0xff]   ;;  %v3673_v6 = vld [vmem:[%s4503_s2 + $0x20] sm:$0xff]  }
   0x4   :  { %3298 = vmatpush3.bf16.msra.mxu0 %v3669_v0  ;;  %3299 = vmatprep.mubr.msk.bf16.mxu0 %vm3774_vm0, %v3773_v1  ;;  %v3674_v7 = vld [vmem:[%s4503_s2 + $0x28] sm:$0xff]   ;;  %v3675_v8 = vld [vmem:[%s4503_s2 + $0x30] sm:$0xff]   ;;  %v3676_v9 = vld [vmem:[%s4503_s2 + $0x38] sm:$0xff]  }
   0x5   :  { %3304 = vmatpush3.bf16.msra.mxu1 %v3670_v2  ;;  %3305 = vmatprep.mubr.msk.bf16.mxu1 %vm3774_vm0, %v3773_v1  ;;  %v3677_v10 = vld [vmem:[%s4503_s2 + $0x40] sm:$0xff]   ;;  %v3678_v11 = vld [vmem:[%s4503_s2 + $0x48] sm:$0xff]  }
   0x6   :  { %3309 = vmatprep.subr.bf16.mxu0 %v3773_v1  ;;  %3315 = vmatprep.subr.bf16.mxu1 %v3773_v1 }
   0x8   :  { %v3875_v3 = vld [vmem:[%s4520_s27] sm:$0xf] }
   0x9   :  { %3300 = vmatmul.mubr.msk.bf16.vlgmr.msra.gmra.mrb[0].mxu0 %vm282_vm1, %v3875_v3  ;;  %3306 = vmatmul.mubr.msk.bf16.vlgmr.msra.gmra.mrb[0].mxu1 %vm282_vm1, %v3875_v3 }
   0xa   :  { %3310 = vmatpush3.bf16.msra.mxu0 %v3671_v4  ;;  %3316 = vmatpush3.bf16.msra.mxu1 %v3672_v5 }
   0xb   :  { %3311 = vmatprep.mubr.msk.bf16.mxu0 %vm3774_vm0, %v3773_v1  ;;  %3317 = vmatprep.mubr.msk.bf16.mxu1 %vm3774_vm0, %v3773_v1 }
   0xc   :  { %3321 = vmatprep.subr.bf16.mxu0 %v3773_v1  ;;  %3327 = vmatprep.subr.bf16.mxu1 %v3773_v1 }
  0x11   :  { %3312 = vmatmul.mubr.msk.bf16.vlgmr.msra.gmra.mrb[4].mxu0 %vm282_vm1, %v3875_v3  ;;  %3318 = vmatmul.mubr.msk.bf16.vlgmr.msra.gmra.mrb[4].mxu1 %vm282_vm1, %v3875_v3 }
  0x12   :  { %3322 = vmatpush3.bf16.msra.mxu0 %v3673_v6  ;;  %3328 = vmatpush3.bf16.msra.mxu1 %v3674_v7 }
  0x13   :  { %3323 = vmatprep.mubr.msk.bf16.mxu0 %vm3774_vm0, %v3773_v1  ;;  %3329 = vmatprep.mubr.msk.bf16.mxu1 %vm3774_vm0, %v3773_v1 }
  0x14   :  { %3333 = vmatprep.subr.bf16.mxu0 %v3773_v1  ;;  %3339 = vmatprep.subr.bf16.mxu1 %v3773_v1 }
  0x19   :  { %3324 = vmatmul.mubr.msk.bf16.vlgmr.msra.gmra.mrb[8].mxu0 %vm282_vm1, %v3875_v3  ;;  %3330 = vmatmul.mubr.msk.bf16.vlgmr.msra.gmra.mrb[8].mxu1 %vm282_vm1, %v3875_v3 }
  0x1a   :  { %3334 = vmatpush3.bf16.msra.mxu0 %v3675_v8  ;;  %3340 = vmatpush3.bf16.msra.mxu1 %v3676_v9 }
  0x1b   :  { %3335 = vmatprep.mubr.msk.bf16.mxu0 %vm3774_vm0, %v3773_v1  ;;  %3341 = vmatprep.mubr.msk.bf16.mxu1 %vm3774_vm0, %v3773_v1 }
  0x1c   :  { %3345 = vmatprep.subr.bf16.mxu0 %v3773_v1  ;;  %3351 = vmatprep.subr.bf16.mxu1 %v3773_v1 }
  0x21   :  { %3336 = vmatmul.mubr.msk.bf16.vlgmr.msra.gmra.mrb[12].mxu0 %vm282_vm1, %v3875_v3  ;;  %3342 = vmatmul.mubr.msk.bf16.vlgmr.msra.gmra.mrb[12].mxu1 %vm282_vm1, %v3875_v3 }
  0x22   :  { %3346 = vmatpush3.bf16.msra.mxu0 %v3677_v10  ;;  %3352 = vmatpush3.bf16.msra.mxu1 %v3678_v11 }
  0x23   :  { %3347 = vmatprep.mubr.msk.bf16.mxu0 %vm3774_vm0, %v3773_v1  ;;  %3353 = vmatprep.mubr.msk.bf16.mxu1 %vm3774_vm0, %v3773_v1 }
  0x24   :  { %3357 = vmatprep.subr.bf16.mxu0 %v3773_v1  ;;  %3363 = vmatprep.subr.bf16.mxu1 %v3773_v1 }
  0x25   :  { %21 = vsyncpa [#allocation3], 0  ;;  %v3679_v12 = vld [vmem:[%s4503_s2 + $0x50] sm:$0xff]   ;;  %v3680_v13 = vld [vmem:[%s4503_s2 + $0x58] sm:$0xff]   ;;  %vm1408_vm2 = vcmask 31744   ;;  %vm1930_vm3 = vcmask 1043456  }
  0x26   :  { %v3681_v14 = vld [vmem:[%s4503_s2 + $0x60] sm:$0xff]   ;;  %v3682_v15 = vld [vmem:[%s4503_s2 + $0x68] sm:$0xff]   ;;  %v3683_v16 = vld [vmem:[%s4503_s2 + $0x70] sm:$0xff]   ;;  %vm1798_vm6 = vcmask 64512  }
  0x27   :  { %v3684_v17 = vld [vmem:[%s4503_s2 + $0x78] sm:$0xff]   ;;  %v3685_v18 = vld [vmem:[%s4503_s2 + $0x80] sm:$0xff]   ;;  %v3686_v19 = vld [vmem:[%s4503_s2 + $0x88] sm:$0xff]  }
  0x28   :  { %v3687_v20 = vld [vmem:[%s4503_s2 + $0x90] sm:$0xff]   ;;  %v3688_v21 = vld [vmem:[%s4503_s2 + $0x98] sm:$0xff]   ;;  %v3689_v22 = vld [vmem:[%s4503_s2 + $0xa0] sm:$0xff]  }
  0x29   :  { %3348 = vmatmul.mubr.msk.bf16.vlgmr.msra.gmra.mrb[16].mxu0 %vm282_vm1, %v3875_v3  ;;  %3354 = vmatmul.mubr.msk.bf16.vlgmr.msra.gmra.mrb[16].mxu1 %vm282_vm1, %v3875_v3  ;;  %v3690_v23 = vld [vmem:[%s4503_s2 + $0xa8] sm:$0xff]   ;;  %v3691_v24 = vld [vmem:[%s4503_s2 + $0xb0] sm:$0xff]   ;;  %v3692_v25 = vld [vmem:[%s4503_s2 + $0xb8] sm:$0xff]  }
  0x2a   :  { %3358 = vmatpush3.bf16.msra.mxu0 %v3679_v12  ;;  %3364 = vmatpush3.bf16.msra.mxu1 %v3680_v13  ;;  %v3066_v58 = vld [vmem:[%s4504_s3 + $0x8] ss:$0 sm:$0xff]  ;;  %v3067_v59 = vld [vmem:[%s4504_s3 + $0x9] ss:$0 sm:$0xff]  ;;  %v3058_v7 = vld [vmem:[%s4504_s3] ss:$0 sm:$0xff] }
  0x2b   :  { %3359 = vmatprep.mubr.msk.bf16.mxu0 %vm3774_vm0, %v3773_v1  ;;  %3365 = vmatprep.mubr.msk.bf16.mxu1 %vm3774_vm0, %v3773_v1  ;;  %v3059_v10 = vld [vmem:[%s4504_s3 + $0x1] ss:$0 sm:$0xff]  ;;  %v3068_v13 = vld [vmem:[%s4504_s3 + $0xa] ss:$0 sm:$0xff] }
  0x2c   :  { %3369 = vmatprep.subr.bf16.mxu0 %v3773_v1  ;;  %3375 = vmatprep.subr.bf16.mxu1 %v3773_v1 }
  0x31   :  { %3360 = vmatmul.mubr.msk.bf16.vlgmr.msra.gmra.mrb[20].mxu0 %vm282_vm1, %v3875_v3  ;;  %3366 = vmatmul.mubr.msk.bf16.vlgmr.msra.gmra.mrb[20].mxu1 %vm282_vm1, %v3875_v3 }
  0x32   :  { %3370 = vmatpush3.bf16.msra.mxu0 %v3681_v14  ;;  %3376 = vmatpush3.bf16.msra.mxu1 %v3682_v15  ;;  %v3069_v15 = vld [vmem:[%s4504_s3 + $0xb] ss:$0 sm:$0xff] }
  0x33   :  { %3371 = vmatprep.mubr.msk.bf16.mxu0 %vm3774_vm0, %v3773_v1  ;;  %3377 = vmatprep.mubr.msk.bf16.mxu1 %vm3774_vm0, %v3773_v1 }
  0x34   :  { %3381 = vmatprep.subr.bf16.mxu0 %v3773_v1  ;;  %3387 = vmatprep.subr.bf16.mxu1 %v3773_v1 }
  0x39   :  { %3372 = vmatmul.mubr.msk.bf16.vlgmr.msra.gmra.mrb[24].mxu0 %vm282_vm1, %v3875_v3  ;;  %3378 = vmatmul.mubr.msk.bf16.vlgmr.msra.gmra.mrb[24].mxu1 %vm282_vm1, %v3875_v3 }
  0x3a   :  { %3382 = vmatpush3.bf16.msra.mxu0 %v3683_v16  ;;  %3388 = vmatpush3.bf16.msra.mxu1 %v3684_v17 }
  0x3b   :  { %3383 = vmatprep.mubr.msk.bf16.mxu0 %vm3774_vm0, %v3773_v1  ;;  %3389 = vmatprep.mubr.msk.bf16.mxu1 %vm3774_vm0, %v3773_v1 }
  0x3c   :  { %3393 = vmatprep.subr.bf16.mxu0 %v3773_v1  ;;  %3399 = vmatprep.subr.bf16.mxu1 %v3773_v1 }
  0x41   :  { %3384 = vmatmul.mubr.msk.bf16.vlgmr.msra.gmra.mrb[28].mxu0 %vm282_vm1, %v3875_v3  ;;  %3390 = vmatmul.mubr.msk.bf16.vlgmr.msra.gmra.mrb[28].mxu1 %vm282_vm1, %v3875_v3 }
  0x42   :  { %3395 = vmatprep.mubr.msk.bf16.mxu0 %vm3774_vm0, %v3773_v1  ;;  %3401 = vmatprep.mubr.msk.bf16.mxu1 %vm3774_vm0, %v3773_v1 }
  0x43   :  { %3394 = vmatpush3.bf16.msra.mxu0 %v3685_v18  ;;  %3400 = vmatpush3.bf16.msra.mxu1 %v3686_v19 }
  0x44   :  { %3405 = vmatprep.subr.bf16.mxu0 %v3773_v1  ;;  %3411 = vmatprep.subr.bf16.mxu1 %v3773_v1 }
  0x49   :  { %3396 = vmatmul.mubr.msk.bf16.vlgmr.msra.gmra.mrb[32].mxu0 %vm282_vm1, %v3875_v3  ;;  %3402 = vmatmul.mubr.msk.bf16.vlgmr.msra.gmra.mrb[32].mxu1 %vm282_vm1, %v3875_v3 }
  0x4a   :  { %3407 = vmatprep.mubr.msk.bf16.mxu0 %vm3774_vm0, %v3773_v1  ;;  %3406 = vmatpush3.bf16.msra.mxu0 %v3687_v20 }
  0x4b   :  { %3417 = vmatprep.subr.bf16.mxu0 %v3773_v1  ;;  %3413 = vmatprep.mubr.msk.bf16.mxu1 %vm3774_vm0, %v3773_v1 }
  0x4c   :  { %3412 = vmatpush3.bf16.msra.mxu1 %v3688_v21 }
  0x4d   :  { %3423 = vmatprep.subr.bf16.mxu1 %v3773_v1 }
  0x51   :  { %3408 = vmatmul.mubr.msk.bf16.vlgmr.msra.gmra.mrb[36].mxu0 %vm282_vm1, %v3875_v3  ;;  %3414 = vmatmul.mubr.msk.bf16.vlgmr.msra.gmra.mrb[36].mxu1 %vm282_vm1, %v3875_v3 }
  0x52   :  { %3419 = vmatprep.mubr.msk.bf16.mxu0 %vm3774_vm0, %v3773_v1  ;;  %3418 = vmatpush3.bf16.msra.mxu0 %v3689_v22 }
  0x53   :  { %3429 = vmatprep.subr.bf16.mxu0 %v3773_v1  ;;  %3425 = vmatprep.mubr.msk.bf16.mxu1 %vm3774_vm0, %v3773_v1 }
  0x54   :  { %3424 = vmatpush3.bf16.msra.mxu1 %v3690_v23 }
  0x55   :  { %3435 = vmatprep.subr.bf16.mxu1 %v3773_v1 }
  0x59   :  { %3420 = vmatmul.mubr.msk.bf16.vlgmr.msra.gmra.mrb[40].mxu0 %vm282_vm1, %v3875_v3  ;;  %3426 = vmatmul.mubr.msk.bf16.vlgmr.msra.gmra.mrb[40].mxu1 %vm282_vm1, %v3875_v3 }
  0x5a   :  { %3431 = vmatprep.mubr.msk.bf16.mxu0 %vm3774_vm0, %v3773_v1  ;;  %3430 = vmatpush3.bf16.msra.mxu0 %v3691_v24 }
  0x5b   :  { %3436 = vmatpush3.bf16.msra.mxu1 %v3692_v25  ;;  %3437 = vmatprep.mubr.msk.bf16.mxu1 %vm3774_vm0, %v3773_v1 }
  0x5c   :  { %3441 = vmatprep.subr.bf16.mxu0 %v3773_v1  ;;  %3447 = vmatprep.subr.bf16.mxu1 %v3773_v1 }
  0x61   :  { %3432 = vmatmul.mubr.msk.bf16.vlgmr.msra.gmra.mrb[44].mxu0 %vm282_vm1, %v3875_v3  ;;  %3438 = vmatmul.mubr.msk.bf16.vlgmr.msra.gmra.mrb[44].mxu1 %vm282_vm1, %v3875_v3 }
  0x62   :  { %3443 = vmatprep.mubr.msk.bf16.mxu0 %vm3774_vm0, %v3773_v1  ;;  %3449 = vmatprep.mubr.msk.bf16.mxu1 %vm3774_vm0, %v3773_v1 }
  0xdc   :  { %v320_v26 = vpop.f32.mrb[0].mxu0  ;;  %v366_v28 = vpop.f32.mrb[0].mxu1 }
  0xdd   :  { %v3301_v27 = vpop.f32.mrb[1].mxu0  ;;  %v3307_v30 = vpop.f32.mrb[1].mxu1  ;;  %v321_v14 = vadd.f32 %v3058_v7, %v320_v26  ;;  %v367_v16 = vadd.f32 %v3059_v10, %v366_v28 }
  0xde   :  { %v323_v29 = vpop.f32.mrb[2].mxu0  ;;  %v369_v32 = vpop.f32.mrb[2].mxu1 }
  0xdf   :  { %v3302_v31 = vpop.f32.mrb[3].mxu0  ;;  %v3308_v33 = vpop.f32.mrb[3].mxu1  ;;  %v1384_v24 = vpack.c.bf16 %v321_v14, %v321_v14  ;;  %v3060_v29 = vld [vmem:[%s4504_s3 + $0x2] ss:$0 sm:$0xff]  ;;  %v1385_v30 = vpack.c.bf16 %v367_v16, %v367_v16  ;;  %v3061_v32 = vld [vmem:[%s4504_s3 + $0x3] ss:$0 sm:$0xff] }
  0xe4   :  { %v4065_v34 = vpop.f32.mrb[4].mxu0  ;;  %v4067_v36 = vpop.f32.mrb[4].mxu1 }
  0xe5   :  { %v3313_v35 = vpop.f32.mrb[5].mxu0  ;;  %v3319_v38 = vpop.f32.mrb[5].mxu1 }
  0xe6   :  { %v415_v37 = vpop.f32.mrb[6].mxu0  ;;  %v461_v40 = vpop.f32.mrb[6].mxu1  ;;  %v413_v38 = vadd.f32 %v3060_v29, %v4065_v34 }
  0xe7   :  { %v3314_v39 = vpop.f32.mrb[7].mxu0  ;;  %v3320_v41 = vpop.f32.mrb[7].mxu1  ;;  %v3070_v37 = vld [vmem:[%s4504_s3 + $0xc] ss:$0 sm:$0xff]  ;;  %v459_v40 = vadd.f32 %v3061_v32, %v4067_v36  ;;  %v3062_v36 = vld [vmem:[%s4504_s3 + $0x4] ss:$0 sm:$0xff] }
  0xe8   :  { %v3071_v39 = vld [vmem:[%s4504_s3 + $0xd] ss:$0 sm:$0xff] }
  0xec   :  { %v4069_v42 = vpop.f32.mrb[8].mxu0  ;;  %v4071_v44 = vpop.f32.mrb[8].mxu1 }
  0xed   :  { %v3325_v43 = vpop.f32.mrb[9].mxu0  ;;  %v3331_v46 = vpop.f32.mrb[9].mxu1 }
  0xee   :  { %v507_v45 = vpop.f32.mrb[10].mxu0  ;;  %v553_v48 = vpop.f32.mrb[10].mxu1 }
  0xef   :  { %v3326_v47 = vpop.f32.mrb[11].mxu0  ;;  %v3332_v49 = vpop.f32.mrb[11].mxu1 }
  0xf0   :  { %v1386_v49 = vpack.c.bf16 %v413_v38, %v413_v38 }
  0xf4   :  { %v4073_v50 = vpop.f32.mrb[12].mxu0  ;;  %v4075_v52 = vpop.f32.mrb[12].mxu1 }
  0xf5   :  { %v3337_v51 = vpop.f32.mrb[13].mxu0  ;;  %v3343_v54 = vpop.f32.mrb[13].mxu1 }
  0xf6   :  { %v599_v53 = vpop.f32.mrb[14].mxu0  ;;  %v645_v56 = vpop.f32.mrb[14].mxu1 }
  0xf7   :  { %v3338_v55 = vpop.f32.mrb[15].mxu0  ;;  %v3344_v57 = vpop.f32.mrb[15].mxu1 }
  0xf8   :  { %v1387_v55 = vpack.c.bf16 %v459_v40, %v459_v40 }
  0xfc   :  { %v688_v60 = vpop.f32.mrb[16].mxu0  ;;  %v734_v62 = vpop.f32.mrb[16].mxu1 }
  0xfd   :  { %v689_v61 = vadd.f32 %v3066_v58, %v688_v60  ;;  %v3349_v63 = vpop.f32.mrb[17].mxu0  ;;  %v735_v0 = vadd.f32 %v3067_v59, %v734_v62  ;;  %v3355_v3 = vpop.f32.mrb[17].mxu1  ;;  %v3063_v58 = vld [vmem:[%s4504_s3 + $0x5] ss:$0 sm:$0xff]  ;;  %v505_v62 = vadd.f32 %v3062_v36, %v4069_v42 }
  0xfe   :  { %v691_v2 = vpop.f32.mrb[18].mxu0  ;;  %v737_v6 = vpop.f32.mrb[18].mxu1  ;;  %v3073_v63 = vld [vmem:[%s4504_s3 + $0xf] ss:$0 sm:$0xff] }
  0xff   :  { %v1392_v4 = vpack.c.bf16 %v689_v61, %v689_v61  ;;  %v3350_v5 = vpop.f32.mrb[19].mxu0  ;;  %v1393_v8 = vpack.c.bf16 %v735_v0, %v735_v0  ;;  %v3356_v9 = vpop.f32.mrb[19].mxu1  ;;  %v3072_v61 = vld [vmem:[%s4504_s3 + $0xe] ss:$0 sm:$0xff]  ;;  %v551_v0 = vadd.f32 %v3063_v58, %v4071_v44  ;;  %v3064_v44 = vld [vmem:[%s4504_s3 + $0x6] ss:$0 sm:$0xff] }
 0x101   :  { %v1413_v11 = vsel %vm1408_vm2, %v1392_v4, 0  ;;  %v1459_v12 = vsel %vm1408_vm2, %v1393_v8, 0  ;;  %v1388_v8 = vpack.c.bf16 %v505_v62, %v505_v62 }
 0x102   :  { %3442 = vmatpush3.bf16.xpose.msra.mxu0 %v1413_v11  ;;  %3448 = vmatpush3.bf16.xpose.msra.mxu1 %v1459_v12  ;;  %v1389_v12 = vpack.c.bf16 %v551_v0, %v551_v0 }
 0x103   :  { %3453 = vmatprep.subr.bf16.mxu0 %v3773_v1  ;;  %3459 = vmatprep.subr.bf16.mxu1 %v3773_v1 }
 0x104   :  { %v780_v17 = vpop.f32.mrb[20].mxu0  ;;  %v826_v19 = vpop.f32.mrb[20].mxu1 }
 0x105   :  { %v781_v18 = vadd.f32 %v3068_v13, %v780_v17  ;;  %v3361_v20 = vpop.f32.mrb[21].mxu0  ;;  %v827_v21 = vadd.f32 %v3069_v15, %v826_v19  ;;  %v3367_v22 = vpop.f32.mrb[21].mxu1  ;;  %v3065_v15 = vld [vmem:[%s4504_s3 + $0x7] ss:$0 sm:$0xff] }
 0x106   :  { %v783_v23 = vpop.f32.mrb[22].mxu0  ;;  %v829_v26 = vpop.f32.mrb[22].mxu1  ;;  %v643_v19 = vadd.f32 %v3065_v15, %v4075_v52 }
 0x107   :  { %v1394_v25 = vpack.c.bf16 %v781_v18, %v781_v18  ;;  %v3362_v27 = vpop.f32.mrb[23].mxu0  ;;  %v1395_v31 = vpack.c.bf16 %v827_v21, %v827_v21  ;;  %v3368_v28 = vpop.f32.mrb[23].mxu1  ;;  %v597_v18 = vadd.f32 %v3064_v44, %v4073_v50  ;;  %v3074_v50 = vld [vmem:[%s4504_s3 + $0x10] ss:$0 sm:$0xff] }
 0x108   :  { %v1391_v21 = vpack.c.bf16 %v643_v19, %v643_v19  ;;  %v3075_v27 = vld [vmem:[%s4504_s3 + $0x11] ss:$0 sm:$0xff] }
 0x109   :  { %v1505_v33 = vsel %vm1408_vm2, %v1394_v25, 0  ;;  %3444 = vmatmul.mubr.msk.bf16.vlgmr.msra.gmra.mrb[48].mxu0 %vm1408_vm2, %v1384_v24  ;;  %v1551_v35 = vsel %vm1408_vm2, %v1395_v31, 0  ;;  %3450 = vmatmul.mubr.msk.bf16.vlgmr.msra.gmra.mrb[48].mxu1 %vm1408_vm2, %v1385_v30  ;;  %v1390_v20 = vpack.c.bf16 %v597_v18, %v597_v18  ;;  %v3076_v30 = vld [vmem:[%s4504_s3 + $0x12] ss:$0 sm:$0xff] }
 0x10a   :  { %3454 = vmatpush3.bf16.xpose.msra.mxu0 %v1505_v33  ;;  %3460 = vmatpush3.bf16.xpose.msra.mxu1 %v1551_v35 }
 0x10b   :  { %3455 = vmatprep.mubr.msk.bf16.mxu0 %vm3774_vm0, %v3773_v1  ;;  %3461 = vmatprep.mubr.msk.bf16.mxu1 %vm3774_vm0, %v3773_v1 }
 0x10c   :  { %v872_v41 = vpop.f32.mrb[24].mxu0  ;;  %3465 = vmatprep.subr.bf16.mxu0 %v3773_v1  ;;  %v918_v45 = vpop.f32.mrb[24].mxu1  ;;  %3471 = vmatprep.subr.bf16.mxu1 %v3773_v1 }
 0x10d   :  { %v873_v43 = vadd.f32 %v3070_v37, %v872_v41  ;;  %v3373_v46 = vpop.f32.mrb[25].mxu0  ;;  %v919_v34 = vadd.f32 %v3071_v39, %v918_v45  ;;  %v3379_v47 = vpop.f32.mrb[25].mxu1 }
 0x10e   :  { %v875_v48 = vpop.f32.mrb[26].mxu0  ;;  %v921_v53 = vpop.f32.mrb[26].mxu1 }
 0x10f   :  { %v1396_v51 = vpack.c.bf16 %v873_v43, %v873_v43  ;;  %v3374_v54 = vpop.f32.mrb[27].mxu0  ;;  %v1397_v56 = vpack.c.bf16 %v919_v34, %v919_v34  ;;  %v3380_v57 = vpop.f32.mrb[27].mxu1  ;;  %v3077_v34 = vld [vmem:[%s4504_s3 + $0x13] ss:$0 sm:$0xff]  ;;  %v3078_v48 = vld [vmem:[%s4504_s3 + $0x14] ss:$0 sm:$0xff] }
 0x111   :  { %v1597_v59 = vsel %vm1408_vm2, %v1396_v51, 0  ;;  %3456 = vmatmul.mubr.msk.bf16.vlgmr.msra.gmra.mrb[52].mxu0 %vm1408_vm2, %v1386_v49  ;;  %v1643_v60 = vsel %vm1408_vm2, %v1397_v56, 0  ;;  %3462 = vmatmul.mubr.msk.bf16.vlgmr.msra.gmra.mrb[52].mxu1 %vm1408_vm2, %v1387_v55 }
 0x112   :  { %3466 = vmatpush3.bf16.xpose.msra.mxu0 %v1597_v59  ;;  %3472 = vmatpush3.bf16.xpose.msra.mxu1 %v1643_v60 }
 0x113   :  { %3467 = vmatprep.mubr.msk.bf16.mxu0 %vm3774_vm0, %v3773_v1  ;;  %3473 = vmatprep.mubr.msk.bf16.mxu1 %vm3774_vm0, %v3773_v1 }
 0x114   :  { %v964_v2 = vpop.f32.mrb[28].mxu0  ;;  %3477 = vmatprep.subr.bf16.mxu0 %v3773_v1  ;;  %v1010_v4 = vpop.f32.mrb[28].mxu1  ;;  %3483 = vmatprep.subr.bf16.mxu1 %v3773_v1 }
 0x115   :  { %v965_v3 = vadd.f32 %v3072_v61, %v964_v2  ;;  %v3385_v42 = vpop.f32.mrb[29].mxu0  ;;  %v1011_v5 = vadd.f32 %v3073_v63, %v1010_v4  ;;  %v3391_v7 = vpop.f32.mrb[29].mxu1  ;;  %v3079_v63 = vld [vmem:[%s4504_s3 + $0x15] ss:$0 sm:$0xff] }
 0x116   :  { %v967_v6 = vpop.f32.mrb[30].mxu0  ;;  %v1013_v11 = vpop.f32.mrb[30].mxu1 }
 0x117   :  { %v1398_v9 = vpack.c.bf16 %v965_v3, %v965_v3  ;;  %v3386_v10 = vpop.f32.mrb[31].mxu0  ;;  %v1399_v13 = vpack.c.bf16 %v1011_v5, %v1011_v5  ;;  %v3392_v14 = vpop.f32.mrb[31].mxu1  ;;  %v3080_v3 = vld [vmem:[%s4504_s3 + $0x16] ss:$0 sm:$0xff] }
 0x118   :  { %v3081_v14 = vld [vmem:[%s4504_s3 + $0x17] ss:$0 sm:$0xff] }
 0x119   :  { %v1689_v16 = vsel %vm1408_vm2, %v1398_v9, 0  ;;  %3468 = vmatmul.mubr.msk.bf16.vlgmr.msra.gmra.mrb[56].mxu0 %vm1408_vm2, %v1388_v8  ;;  %v1735_v17 = vsel %vm1408_vm2, %v1399_v13, 0  ;;  %3474 = vmatmul.mubr.msk.bf16.vlgmr.msra.gmra.mrb[56].mxu1 %vm1408_vm2, %v1389_v12 }
 0x11a   :  { %3478 = vmatpush3.bf16.xpose.msra.mxu0 %v1689_v16  ;;  %3484 = vmatpush3.bf16.xpose.msra.mxu1 %v1735_v17 }
 0x11b   :  { %3479 = vmatprep.mubr.msk.bf16.mxu0 %vm3774_vm0, %v3773_v1  ;;  %3485 = vmatprep.mubr.msk.bf16.mxu1 %vm3774_vm0, %v3773_v1 }
 0x11c   :  { %3489 = vmatprep.subr.bf16.mxu0 %v3773_v1  ;;  %3495 = vmatprep.subr.bf16.mxu1 %v3773_v1  ;;  %v1056_v52 = vpop.f32.mrb[32].mxu0  ;;  %v1102_v31 = vpop.f32.mrb[32].mxu1 }
 0x11d   :  { %v1057_v22 = vadd.f32 %v3074_v50, %v1056_v52  ;;  %v3397_v23 = vpop.f32.mrb[33].mxu0  ;;  %v1103_v28 = vadd.f32 %v3075_v27, %v1102_v31  ;;  %v3403_v32 = vpop.f32.mrb[33].mxu1  ;;  %v58_v52 = vld [vmem:[%s4502_s1] sm:$0x3] }
 0x11e   :  { %v1059_v24 = vpop.f32.mrb[34].mxu0  ;;  %v1105_v35 = vpop.f32.mrb[34].mxu1  ;;  %vm59_vm4 = vnez %v58_v52 }
 0x11f   :  { %v1400_v25 = vpack.c.bf16 %v1057_v22, %v1057_v22  ;;  %v3398_v26 = vpop.f32.mrb[35].mxu0  ;;  %v1401_v39 = vpack.c.bf16 %v1103_v28, %v1103_v28  ;;  %v3404_v40 = vpop.f32.mrb[35].mxu1  ;;  %v3775_v22 = vmov 0  }
 0x120   :  { %v1785_v23 = vsel %vm59_vm4, 16843009, %v3775_v22 }
 0x121   :  { %3480 = vmatmul.mubr.msk.bf16.vlgmr.msra.gmra.mrb[60].mxu0 %vm1408_vm2, %v1390_v20  ;;  %3486 = vmatmul.mubr.msk.bf16.vlgmr.msra.gmra.mrb[60].mxu1 %vm1408_vm2, %v1391_v21  ;;  %v1932_v29 = vsel %vm1930_vm3, %v1400_v25, 0  ;;  %v1978_v46 = vsel %vm1930_vm3, %v1401_v39, 0  ;;  %v1786_v24 = vunpack.c.0.s8 %v1785_v23 }
 0x122   :  { %3491 = vmatprep.mubr.msk.bf16.mxu0 %vm3774_vm0, %v3773_v1  ;;  %3497 = vmatprep.mubr.msk.bf16.mxu1 %vm3774_vm0, %v3773_v1 }
 0x123   :  { %3490 = vmatpush3.bf16.msra.mxu0 %v1932_v29  ;;  %3496 = vmatpush3.bf16.msra.mxu1 %v1978_v46  ;;  %vm4220_vm5 = vcmp.ne.s32.totalorder %v1786_v24, 0 }
 0x124   :  { %3501 = vmatprep.subr.bf16.mxu0 %v3773_v1  ;;  %v1148_v33 = vpop.f32.mrb[36].mxu0  ;;  %3507 = vmatprep.subr.bf16.mxu1 %v3773_v1  ;;  %v1194_v49 = vpop.f32.mrb[36].mxu1 }
 0x125   :  { %v1149_v37 = vadd.f32 %v3076_v30, %v1148_v33  ;;  %v3409_v38 = vpop.f32.mrb[37].mxu0  ;;  %v1195_v51 = vadd.f32 %v3077_v34, %v1194_v49  ;;  %v3415_v53 = vpop.f32.mrb[37].mxu1 }
 0x126   :  { %v1151_v41 = vpop.f32.mrb[38].mxu0  ;;  %v1197_v36 = vpop.f32.mrb[38].mxu1 }
 0x127   :  { %v1402_v43 = vpack.c.bf16 %v1149_v37, %v1149_v37  ;;  %v3410_v45 = vpop.f32.mrb[39].mxu0  ;;  %v1403_v57 = vpack.c.bf16 %v1195_v51, %v1195_v51  ;;  %v3416_v58 = vpop.f32.mrb[39].mxu1 }
 0x129   :  { %v4187_v47 = vsel %vm1930_vm3, %v1402_v43, 0  ;;  %v4194_v62 = vsel %vm1930_vm3, %v1403_v57, 0 }
 0x12c   :  { %v1240_v54 = vpop.f32.mrb[40].mxu0  ;;  %v1286_v2 = vpop.f32.mrb[40].mxu1 }
 0x12d   :  { %v1241_v55 = vadd.f32 %v3078_v48, %v1240_v54  ;;  %v3421_v56 = vpop.f32.mrb[41].mxu0  ;;  %v1287_v4 = vadd.f32 %v3079_v63, %v1286_v2  ;;  %v3427_v42 = vpop.f32.mrb[41].mxu1 }
 0x12e   :  { %v1243_v59 = vpop.f32.mrb[42].mxu0  ;;  %v1289_v5 = vpop.f32.mrb[42].mxu1 }
 0x12f   :  { %v1404_v60 = vpack.c.bf16 %v1241_v55, %v1241_v55  ;;  %v3422_v61 = vpop.f32.mrb[43].mxu0  ;;  %v1405_v7 = vpack.c.bf16 %v1287_v4, %v1287_v4  ;;  %v3428_v8 = vpop.f32.mrb[43].mxu1 }
 0x131   :  { %v4200_v0 = vsel %vm1930_vm3, %v1404_v60, 0  ;;  %v4206_v11 = vsel %vm1930_vm3, %v1405_v7, 0 }
 0x134   :  { %v1332_v6 = vpop.f32.mrb[44].mxu0  ;;  %v1378_v16 = vpop.f32.mrb[44].mxu1 }
 0x135   :  { %v1333_v9 = vadd.f32 %v3080_v3, %v1332_v6  ;;  %v3433_v10 = vpop.f32.mrb[45].mxu0  ;;  %v1379_v17 = vadd.f32 %v3081_v14, %v1378_v16  ;;  %v3439_v18 = vpop.f32.mrb[45].mxu1 }
 0x136   :  { %v1335_v12 = vpop.f32.mrb[46].mxu0  ;;  %v1381_v19 = vpop.f32.mrb[46].mxu1 }
 0x137   :  { %v1406_v44 = vpack.c.bf16 %v1333_v9, %v1333_v9  ;;  %v3434_v13 = vpop.f32.mrb[47].mxu0  ;;  %v1407_v20 = vpack.c.bf16 %v1379_v17, %v1379_v17  ;;  %v3440_v21 = vpop.f32.mrb[47].mxu1 }
 0x139   :  { %v4212_v15 = vsel %vm1930_vm3, %v1406_v44, 0  ;;  %v4215_v50 = vsel %vm1930_vm3, %v1407_v20, 0 }
 0x1dc   :  { %v1449_v25 = vpop.f32.mrb[48].mxu0  ;;  %v1495_v29 = vpop.f32.mrb[48].mxu1 }
 0x1dd   :  { %v1777_v27 = vmul.f32 0.5, %v1449_v25  ;;  %v3445_v30 = vpop.f32.mrb[49].mxu0  ;;  %v1778_v31 = vmul.f32 0.5, %v1495_v29  ;;  %v3451_v28 = vpop.f32.mrb[49].mxu1 }
 0x1de   :  { %v1452_v32 = vpop.f32.mrb[50].mxu0  ;;  %v1498_v33 = vpop.f32.mrb[50].mxu1 }
 0x1df   :  { %v3446_v35 = vpop.f32.mrb[51].mxu0  ;;  %v1790_v37 = vsel %vm4220_vm5, %v1777_v27, -inf  ;;  %v3452_v38 = vpop.f32.mrb[51].mxu1  ;;  %v1791_v40 = vsel %vm4220_vm5, %v1778_v31, -inf }
 0x1e0   :  { %v1799_v39 = vsel %vm1798_vm6, %v1790_v37, -inf  ;;  %v1802_v43 = vsel %vm1798_vm6, %v1791_v40, -inf }
 0x1e1   :  { %1800 = vmax.xlane.f32.xlu0 %v1799_v39 }
 0x1e4   :  { %v1541_v41 = vpop.f32.mrb[52].mxu0  ;;  %v1587_v46 = vpop.f32.mrb[52].mxu1 }
 0x1e5   :  { %v1779_v45 = vmul.f32 0.5, %v1541_v41  ;;  %1803 = vmax.xlane.f32.xlu0 %v1802_v43  ;;  %v3457_v34 = vpop.f32.mrb[53].mxu0  ;;  %v1780_v48 = vmul.f32 0.5, %v1587_v46  ;;  %v3463_v49 = vpop.f32.mrb[53].mxu1 }
 0x1e6   :  { %v1544_v51 = vpop.f32.mrb[54].mxu0  ;;  %v1590_v53 = vpop.f32.mrb[54].mxu1 }
 0x1e7   :  { %v3458_v54 = vpop.f32.mrb[55].mxu0  ;;  %v1792_v36 = vsel %vm4220_vm5, %v1779_v45, -inf  ;;  %v3464_v55 = vpop.f32.mrb[55].mxu1  ;;  %v1793_v57 = vsel %vm4220_vm5, %v1780_v48, -inf }
 0x1e8   :  { %v1805_v56 = vsel %vm1798_vm6, %v1792_v36, -inf  ;;  %v1808_v59 = vsel %vm1798_vm6, %v1793_v57, -inf }
 0x1e9   :  { %1806 = vmax.xlane.f32.xlu1 %v1805_v56 }
 0x1ec   :  { %v1633_v58 = vpop.f32.mrb[56].mxu0  ;;  %v1679_v61 = vpop.f32.mrb[56].mxu1 }
 0x1ed   :  { %v1781_v60 = vmul.f32 0.5, %v1633_v58  ;;  %1809 = vmax.xlane.f32.xlu1 %v1808_v59  ;;  %v3469_v63 = vpop.f32.mrb[57].mxu0  ;;  %v1782_v2 = vmul.f32 0.5, %v1679_v61  ;;  %v3475_v3 = vpop.f32.mrb[57].mxu1 }
 0x1ee   :  { %v1636_v4 = vpop.f32.mrb[58].mxu0  ;;  %v1682_v42 = vpop.f32.mrb[58].mxu1 }
 0x1ef   :  { %v3470_v5 = vpop.f32.mrb[59].mxu0  ;;  %v1794_v6 = vsel %vm4220_vm5, %v1781_v60, -inf  ;;  %v3476_v7 = vpop.f32.mrb[59].mxu1  ;;  %v1795_v8 = vsel %vm4220_vm5, %v1782_v2, -inf }
 0x1f0   :  { %v1811_v9 = vsel %vm1798_vm6, %v1794_v6, -inf  ;;  %v1814_v10 = vsel %vm1798_vm6, %v1795_v8, -inf }
 0x1f1   :  { %1812 = vmax.xlane.f32.xlu0 %v1811_v9  ;;  %1815 = vmax.xlane.f32.xlu1 %v1814_v10 }
 0x1f4   :  { %v1725_v12 = vpop.f32.mrb[60].mxu0  ;;  %v1771_v13 = vpop.f32.mrb[60].mxu1 }
 0x1f5   :  { %v1783_v44 = vmul.f32 0.5, %v1725_v12  ;;  %v3481_v14 = vpop.f32.mrb[61].mxu0  ;;  %v1784_v16 = vmul.f32 0.5, %v1771_v13  ;;  %v3487_v17 = vpop.f32.mrb[61].mxu1 }
 0x1f6   :  { %v1728_v18 = vpop.f32.mrb[62].mxu0  ;;  %v1774_v19 = vpop.f32.mrb[62].mxu1 }
 0x1f7   :  { %v3482_v20 = vpop.f32.mrb[63].mxu0  ;;  %v1796_v21 = vsel %vm4220_vm5, %v1783_v44, -inf  ;;  %v3488_v52 = vpop.f32.mrb[63].mxu1  ;;  %v1797_v22 = vsel %vm4220_vm5, %v1784_v16, -inf }
 0x1f8   :  { %v1817_v23 = vsel %vm1798_vm6, %v1796_v21, -inf  ;;  %v1820_v24 = vsel %vm1798_vm6, %v1797_v22, -inf }
 0x1f9   :  { %1818 = vmax.xlane.f32.xlu0 %v1817_v23  ;;  %1821 = vmax.xlane.f32.xlu1 %v1820_v24 }
 0x26e   :  { %v1801_v25 = vpop.xlane.xlu0 %1800 }
 0x26f   :  { %vm1823_vm7 = vcmp.gt.f32.partialorder %v1801_v25, -inf }
 0x270   :  { %v1831_v27 = vsel %vm1823_vm7, %v1801_v25, 0.0 }
 0x271   :  { %v1839_v29 = vsub.f32 %v1790_v37, %v1831_v27 }
 0x272   :  { %v1804_v30 = vpop.xlane.xlu0 %1803 }
 0x273   :  { %v1847_v31 = vmul.f32 1.442695, %v1839_v29  ;;  %vm1824_vm8 = vcmp.gt.f32.partialorder %v1804_v30, -inf }
 0x274   :  { %v1832_v28 = vsel %vm1824_vm8, %v1804_v30, 0.0 }
 0x275   :  { %3710 = vpow2.f32 %v1847_v31  ;;  %v1840_v32 = vsub.f32 %v1791_v40, %v1832_v28 }
 0x276   :  { %v1807_v33 = vpop.xlane.xlu1 %1806 }
 0x277   :  { %v1849_v35 = vmul.f32 1.442695, %v1840_v32  ;;  %vm1825_vm9 = vcmp.gt.f32.partialorder %v1807_v33, -inf }
 0x278   :  { %v1833_v26 = vsel %vm1825_vm9, %v1807_v33, 0.0 }
 0x279   :  { %3712 = vpow2.f32 %v1849_v35  ;;  %v1841_v38 = vsub.f32 %v1792_v36, %v1833_v26 }
 0x27a   :  { %v1810_v39 = vpop.xlane.xlu1 %1809 }
 0x27b   :  { %v1851_v41 = vmul.f32 1.442695, %v1841_v38  ;;  %vm1826_vm10 = vcmp.gt.f32.partialorder %v1810_v39, -inf }
 0x27c   :  { %v1834_v43 = vsel %vm1826_vm10, %v1810_v39, 0.0 }
 0x27d   :  { %3714 = vpow2.f32 %v1851_v41  ;;  %v1842_v45 = vsub.f32 %v1793_v57, %v1834_v43 }
 0x27e   :  { %v1813_v46 = vpop.xlane.xlu0 %1812  ;;  %v1816_v48 = vpop.xlane.xlu1 %1815 }
 0x27f   :  { %v4248_v37 = vpop.eup %3710  ;;  %v1853_v34 = vmul.f32 1.442695, %v1842_v45  ;;  %vm1827_vm11 = vcmp.gt.f32.partialorder %v1813_v46, -inf  ;;  %vm1828_vm12 = vcmp.gt.f32.partialorder %v1816_v48, -inf }
 0x280   :  { %v1835_v40 = vsel %vm1827_vm11, %v1813_v46, 0.0  ;;  %v1863_v49 = vsel %vm1798_vm6, %v4248_v37, 0.0  ;;  %v1836_v51 = vsel %vm1828_vm12, %v1816_v48, 0.0  ;;  %vm2315_vm11 = vcmask 1041408  }
 0x281   :  { %3716 = vpow2.f32 %v1853_v34  ;;  %v1843_v53 = vsub.f32 %v1794_v6, %v1835_v40  ;;  %1864 = vadd.xlane.f32.xlu0 %v1863_v49  ;;  %v1844_v54 = vsub.f32 %v1795_v8, %v1836_v51 }
 0x283   :  { %v4252_v36 = vpop.eup %3712  ;;  %v1855_v55 = vmul.f32 1.442695, %v1843_v53  ;;  %v1857_v56 = vmul.f32 1.442695, %v1844_v54 }
 0x284   :  { %v1866_v57 = vsel %vm1798_vm6, %v4252_v36, 0.0 }
 0x285   :  { %3718 = vpow2.f32 %v1855_v55  ;;  %1867 = vadd.xlane.f32.xlu1 %v1866_v57 }
 0x286   :  { %3720 = vpow2.f32 %v1857_v56  ;;  %v1819_v58 = vpop.xlane.xlu0 %1818  ;;  %v1822_v60 = vpop.xlane.xlu1 %1821 }
 0x287   :  { %v4256_v59 = vpop.eup %3714  ;;  %vm1829_vm13 = vcmp.gt.f32.partialorder %v1819_v58, -inf  ;;  %vm1830_vm14 = vcmp.gt.f32.partialorder %v1822_v60, -inf }
 0x288   :  { %v1837_v61 = vsel %vm1829_vm13, %v1819_v58, 0.0  ;;  %v1869_v63 = vsel %vm1798_vm6, %v4256_v59, 0.0  ;;  %v1838_v2 = vsel %vm1830_vm14, %v1822_v60, 0.0 }
 0x289   :  { %v1845_v3 = vsub.f32 %v1796_v21, %v1837_v61  ;;  %1870 = vadd.xlane.f32.xlu0 %v1869_v63  ;;  %v1846_v4 = vsub.f32 %v1797_v22, %v1838_v2 }
 0x28b   :  { %v4260_v42 = vpop.eup %3716  ;;  %v1859_v5 = vmul.f32 1.442695, %v1845_v3  ;;  %v1861_v6 = vmul.f32 1.442695, %v1846_v4 }
 0x28c   :  { %v1872_v7 = vsel %vm1798_vm6, %v4260_v42, 0.0 }
 0x28d   :  { %3722 = vpow2.f32 %v1859_v5  ;;  %1873 = vadd.xlane.f32.xlu1 %v1872_v7 }
 0x28e   :  { %3724 = vpow2.f32 %v1861_v6 }
 0x28f   :  { %v4264_v8 = vpop.eup %3718 }
 0x290   :  { %v4266_v9 = vpop.eup %3720  ;;  %v1875_v10 = vsel %vm1798_vm6, %v4264_v8, 0.0 }
 0x291   :  { %v1878_v12 = vsel %vm1798_vm6, %v4266_v9, 0.0  ;;  %1876 = vadd.xlane.f32.xlu0 %v1875_v10 }
 0x292   :  { %1879 = vadd.xlane.f32.xlu1 %v1878_v12 }
 0x297   :  { %v4272_v44 = vpop.eup %3722 }
 0x298   :  { %v4274_v13 = vpop.eup %3724  ;;  %v1881_v14 = vsel %vm1798_vm6, %v4272_v44, 0.0 }
 0x299   :  { %v1884_v16 = vsel %vm1798_vm6, %v4274_v13, 0.0  ;;  %1882 = vadd.xlane.f32.xlu0 %v1881_v14 }
 0x29a   :  { %1885 = vadd.xlane.f32.xlu1 %v1884_v16 }
 0x30e   :  { %v1865_v17 = vpop.xlane.xlu0 %1864 }
 0x30f   :  { %vm1887_vm15 = vcmp.gt.f32.partialorder %v1865_v17, 0.0 }
 0x310   :  { %v1895_v18 = vsel %vm1887_vm15, %v1865_v17, 1.0 }
 0x311   :  { %3726 = vrcp.f32 %v1895_v18 }
 0x312   :  { %v1868_v19 = vpop.xlane.xlu1 %1867 }
 0x313   :  { %vm1888_vm3 = vcmp.gt.f32.partialorder %v1868_v19, 0.0 }
 0x314   :  { %v1896_v20 = vsel %vm1888_vm3, %v1868_v19, 1.0 }
 0x315   :  { %3728 = vrcp.f32 %v1896_v20 }
 0x316   :  { %v1871_v21 = vpop.xlane.xlu0 %1870 }
 0x317   :  { %vm1889_vm4 = vcmp.gt.f32.partialorder %v1871_v21, 0.0 }
 0x318   :  { %v1897_v52 = vsel %vm1889_vm4, %v1871_v21, 1.0 }
 0x319   :  { %3730 = vrcp.f32 %v1897_v52 }
 0x31a   :  { %v1874_v22 = vpop.xlane.xlu1 %1873 }
 0x31b   :  { %v3727_v23 = vpop.eup %3726  ;;  %vm1890_vm5 = vcmp.gt.f32.partialorder %v1874_v22, 0.0 }
 0x31c   :  { %v1898_v24 = vsel %vm1890_vm5, %v1874_v22, 1.0  ;;  %v1911_v25 = vmul.f32 %v3727_v23, %v4248_v37 }
 0x31d   :  { %3732 = vrcp.f32 %v1898_v24  ;;  %v2307_v24 = vld [vmem:[%s4505_s4 + $0x6] sm:$0x3] }
 0x31e   :  { %v1877_v27 = vpop.xlane.xlu0 %1876  ;;  %v1919_v29 = vpack.c.bf16 %v1911_v25, %v1911_v25 }
 0x31f   :  { %v3729_v30 = vpop.eup %3728  ;;  %v1880_v31 = vpop.xlane.xlu1 %1879  ;;  %vm1891_vm7 = vcmp.gt.f32.partialorder %v1877_v27, 0.0 }
 0x320   :  { %vm1892_vm8 = vcmp.gt.f32.partialorder %v1880_v31, 0.0  ;;  %v1899_v28 = vsel %vm1891_vm7, %v1877_v27, 1.0  ;;  %3492 = vmatmul.mubr.msk.bf16.vlgmr.msra.gmra.mrb[64].mxu0 %vm1798_vm6, %v1919_v29  ;;  %v1912_v32 = vmul.f32 %v3729_v30, %v4252_v36 }
 0x321   :  { %v1900_v33 = vsel %vm1892_vm8, %v1880_v31, 1.0  ;;  %3734 = vrcp.f32 %v1899_v28  ;;  %3502 = vmatpush3.bf16.msra.mxu0 %v4187_v47  ;;  %3503 = vmatprep.mubr.msk.bf16.mxu0 %vm3774_vm0, %v3773_v1  ;;  %v2455_v31 = vsel %vm2315_vm11, %v2307_v24, 0  ;;  %v3704_v24 = vld [vmem:[%s4515_s14 + $0x10] sm:$0xff]  }
 0x322   :  { %3736 = vrcp.f32 %v1900_v33  ;;  %v1920_v35 = vpack.c.bf16 %v1912_v32, %v1912_v32  ;;  %3513 = vmatprep.subr.bf16.mxu0 %v3773_v1 }
 0x323   :  { %v3731_v26 = vpop.eup %3730 }
 0x324   :  { %3498 = vmatmul.mubr.msk.bf16.vlgmr.msra.gmra.mrb[64].mxu1 %vm1798_vm6, %v1920_v35  ;;  %v1913_v38 = vmul.f32 %v3731_v26, %v4256_v59 }
 0x325   :  { %3508 = vmatpush3.bf16.msra.mxu1 %v4194_v62  ;;  %3509 = vmatprep.mubr.msk.bf16.mxu1 %vm3774_vm0, %v3773_v1 }
 0x326   :  { %v1883_v39 = vpop.xlane.xlu0 %1882  ;;  %v1921_v41 = vpack.c.bf16 %v1913_v38, %v1913_v38  ;;  %3519 = vmatprep.subr.bf16.mxu1 %v3773_v1 }
 0x327   :  { %v3733_v47 = vpop.eup %3732  ;;  %v1886_v43 = vpop.xlane.xlu1 %1885  ;;  %vm1893_vm9 = vcmp.gt.f32.partialorder %v1883_v39, 0.0 }
 0x328   :  { %vm1894_vm10 = vcmp.gt.f32.partialorder %v1886_v43, 0.0  ;;  %v1901_v45 = vsel %vm1893_vm9, %v1883_v39, 1.0  ;;  %3504 = vmatmul.mubr.msk.bf16.vlgmr.msra.gmra.mrb[68].mxu0 %vm1798_vm6, %v1921_v41  ;;  %v1914_v46 = vmul.f32 %v3733_v47, %v4260_v42  ;;  %v2308_v39 = vld [vmem:[%s4505_s4 + $0x8] sm:$0x3] }
 0x329   :  { %v1902_v37 = vsel %vm1894_vm10, %v1886_v43, 1.0  ;;  %3738 = vrcp.f32 %v1901_v45  ;;  %3514 = vmatpush3.bf16.msra.mxu0 %v4200_v0  ;;  %3515 = vmatprep.mubr.msk.bf16.mxu0 %vm3774_vm0, %v3773_v1  ;;  %v2501_v47 = vsel %vm2315_vm11, %v2308_v39, 0  ;;  %v2309_v43 = vld [vmem:[%s4505_s4 + $0xa] sm:$0x3] }
 0x32a   :  { %3740 = vrcp.f32 %v1902_v37  ;;  %v1922_v62 = vpack.c.bf16 %v1914_v46, %v1914_v46  ;;  %3525 = vmatprep.subr.bf16.mxu0 %v3773_v1  ;;  %v2547_v46 = vsel %vm2315_vm11, %v2309_v43, 0  ;;  %v2310_v37 = vld [vmem:[%s4505_s4 + $0xc] sm:$0x3] }
 0x32b   :  { %v3735_v34 = vpop.eup %3734 }
 0x32c   :  { %v3737_v48 = vpop.eup %3736  ;;  %3510 = vmatmul.mubr.msk.bf16.vlgmr.msra.gmra.mrb[68].mxu1 %vm1798_vm6, %v1922_v62  ;;  %v1915_v40 = vmul.f32 %v3735_v34, %v4264_v8  ;;  %v2593_v34 = vsel %vm2315_vm11, %v2310_v37, 0 }
 0x32d   :  { %3520 = vmatpush3.bf16.msra.mxu1 %v4206_v11  ;;  %3521 = vmatprep.mubr.msk.bf16.mxu1 %vm3774_vm0, %v3773_v1  ;;  %v1916_v0 = vmul.f32 %v3737_v48, %v4266_v9  ;;  %v2304_v11 = vld [vmem:[%s4505_s4] sm:$0x3]  ;;  %v2306_v9 = vld [vmem:[%s4505_s4 + $0x4] sm:$0x3]  ;;  %v2311_v48 = vld [vmem:[%s4505_s4 + $0xe] sm:$0x3] }
 0x32e   :  { %v1923_v49 = vpack.c.bf16 %v1915_v40, %v1915_v40  ;;  %3531 = vmatprep.subr.bf16.mxu1 %v3773_v1  ;;  %v2317_v56 = vsel %vm2315_vm11, %v2304_v11, 0  ;;  %v2409_v14 = vsel %vm2315_vm11, %v2306_v9, 0  ;;  %v3154_v11 = vld [vmem:[%s4506_s5] ss:$0 sm:$0xff]  ;;  %v3699_v9 = vld [vmem:[%s4513_s12 + $0x28] sm:$0xff]  }
 0x32f   :  { %v1924_v51 = vpack.c.bf16 %v1916_v0, %v1916_v0  ;;  %v3693_v0 = vld [vmem:[%s4507_s6] sm:$0xff]  }
 0x330   :  { %3516 = vmatmul.mubr.msk.bf16.vlgmr.msra.gmra.mrb[72].mxu0 %vm1798_vm6, %v1923_v49  ;;  %v2639_v49 = vsel %vm2315_vm11, %v2311_v48, 0 }
 0x331   :  { %3526 = vmatpush3.bf16.msra.mxu0 %v4212_v15  ;;  %3527 = vmatprep.mubr.msk.bf16.mxu0 %vm3774_vm0, %v3773_v1 }
 0x332   :  { %3537 = vmatprep.subr.bf16.mxu0 %v3773_v1 }
 0x333   :  { %v3739_v53 = vpop.eup %3738 }
 0x334   :  { %v3741_v54 = vpop.eup %3740  ;;  %3522 = vmatmul.mubr.msk.bf16.vlgmr.msra.gmra.mrb[72].mxu1 %vm1798_vm6, %v1924_v51  ;;  %v1917_v36 = vmul.f32 %v3739_v53, %v4272_v44  ;;  %v3748_v53 = vld [vmem:[%s4520_s27] sm:$0xf] }
 0x335   :  { %3532 = vmatpush3.bf16.msra.mxu1 %v4215_v50  ;;  %3533 = vmatprep.mubr.msk.bf16.mxu1 %vm3774_vm0, %v3773_v1  ;;  %v1918_v55 = vmul.f32 %v3741_v54, %v4274_v13  ;;  %v2305_v50 = vld [vmem:[%s4505_s4 + $0x2] sm:$0x3]  ;;  %v3155_v54 = vld [vmem:[%s4508_s7] ss:$0 sm:$0xff]  ;;  %s3776_s4 = smov [#allocation2]  }
 0x336   :  { %v1925_v15 = vpack.c.bf16 %v1917_v36, %v1917_v36  ;;  %3591 = vmatprep.subr.bf16.mxu1 %v3773_v1  ;;  %v2363_v61 = vsel %vm2315_vm11, %v2305_v50, 0  ;;  %v3631_v36 = vadd.f32 %v3155_v54, %v3154_v11  ;;  %s3050_s3 = sshll.u32 %s3776_s4, 4  ;;  %s3051_s3 = int_to_ptr.vmem [resolvable:$true] %s3050_s3 }
 0x337   :  { %v1926_v57 = vpack.c.bf16 %v1918_v55, %v1918_v55  ;;  %s3749_s19 = scalar_lea.vmem %s3051_s3, 128  ;;  %p3754_p1 = scmp.lt.s32.totalorder %s3051_s3, %s3051_s3 }
 0x338   :  { %3528 = vmatmul.mubr.msk.bf16.vlgmr.msra.gmra.mrb[76].mxu0 %vm1798_vm6, %v1925_v15  ;;  %p3750_p0 = scmp.ne.s32.totalorder %s3051_s3, %s3749_s19  ;;  %p3755_p2 = scmp.lt.s32.totalorder %s3749_s19, %s3749_s19 }
 0x339   :  { %3538 = vmatpush3.bf16.msra.mxu0 %v2317_v56  ;;  %3539 = vmatprep.mubr.msk.bf16.mxu0 %vm3774_vm0, %v3773_v1 }
 0x33a   :  { %3543 = vmatprep.subr.bf16.mxu0 %v3773_v1  ;;  %p3756_p3 = por %p3755_p2, %p3754_p1 }
 0x33c   :  { %3534 = vmatmul.mubr.msk.bf16.vlgmr.msra.gmra.mrb[76].mxu1 %vm1798_vm6, %v1926_v57  ;;  %p3757_p4 = pnand %p3756_p3, %p3750_p0 }
 0x33d   :  { %3607 = vmatprep.mubr.msk.bf16.mxu1 %vm3774_vm0, %v3773_v1 }
 0x3f3   :  { %v1968_v58 = vpop.f32.mrb[64].mxu0 }
 0x3f4   :  { %v2296_v59 = vpack.c.bf16 %v1968_v58, %v1968_v58  ;;  %v3493_v60 = vpop.f32.mrb[65].mxu0  ;;  %v3694_v58 = vld [vmem:[%s4513_s12] sm:$0xff]  }
 0x3f5   :  { %v1971_v63 = vpop.f32.mrb[66].mxu0  ;;  %3592 = vmatpush3.bf16.msra.mxu1 %v3694_v58  ;;  %v2751_v60 = vlaneseq  ;;  %v3180_v58 = vld [vmem:[%s4512_s11] ss:$0 sm:$0xff] }
 0x3f6   :  { %v3494_v2 = vpop.f32.mrb[67].mxu0  ;;  %3540 = vmatmul.mubr.msk.bf16.vlgmr.msra.gmra.mrb[80].mxu0 %vm1408_vm2, %v2296_v59  ;;  %v3695_v59 = vld [vmem:[%s4513_s12 + $0x8] sm:$0xff]   ;;  %3593 = vmatprep.subr.bf16.mxu1 %v3773_v1 }
 0x3f7   :  { %v2014_v3 = vpop.f32.mrb[64].mxu1  ;;  %3544 = vmatpush3.bf16.msra.mxu0 %v2363_v61  ;;  %3545 = vmatprep.mubr.msk.bf16.mxu0 %vm3774_vm0, %v3773_v1  ;;  %v2752_v61 = vand.u32 127, %v2751_v60 }
 0x3f8   :  { %v3499_v4 = vpop.f32.mrb[65].mxu1  ;;  %3549 = vmatprep.subr.bf16.mxu0 %v3773_v1  ;;  %v2297_v44 = vpack.c.bf16 %v2014_v3, %v2014_v3 }
 0x3f9   :  { %v2017_v42 = vpop.f32.mrb[66].mxu1  ;;  %3594 = vmatpush3.bf16.msra.mxu1 %v3695_v59 }
 0x3fa   :  { %v3500_v5 = vpop.f32.mrb[67].mxu1  ;;  %3595 = vmatprep.subr.bf16.mxu1 %v3773_v1 }
 0x3fb   :  { %v2060_v6 = vpop.f32.mrb[68].mxu0 }
 0x3fc   :  { %v3505_v7 = vpop.f32.mrb[69].mxu0  ;;  %v2298_v29 = vpack.c.bf16 %v2060_v6, %v2060_v6  ;;  %v3696_v6 = vld [vmem:[%s4513_s12 + $0x10] sm:$0xff]  }
 0x3fd   :  { %v2063_v8 = vpop.f32.mrb[70].mxu0  ;;  %3596 = vmatpush3.bf16.msra.mxu1 %v3696_v6  ;;  %v3697_v7 = vld [vmem:[%s4513_s12 + $0x18] sm:$0xff]  }
 0x3fe   :  { %v3506_v10 = vpop.f32.mrb[71].mxu0  ;;  %3597 = vmatprep.subr.bf16.mxu1 %v3773_v1  ;;  %v3698_v8 = vld [vmem:[%s4513_s12 + $0x20] sm:$0xff]  }
 0x3ff   :  { %v2106_v12 = vpop.f32.mrb[68].mxu1  ;;  %v3700_v10 = vld [vmem:[%s4513_s12 + $0x30] sm:$0xff]  }
 0x400   :  { %v3511_v13 = vpop.f32.mrb[69].mxu1  ;;  %v2299_v41 = vpack.c.bf16 %v2106_v12, %v2106_v12  ;;  %v3701_v12 = vld [vmem:[%s4513_s12 + $0x38] sm:$0xff]  }
 0x401   :  { %v2109_v16 = vpop.f32.mrb[70].mxu1  ;;  %3598 = vmatpush3.bf16.msra.mxu1 %v3697_v7 }
 0x402   :  { %v3512_v17 = vpop.f32.mrb[71].mxu1  ;;  %3546 = vmatmul.mubr.msk.bf16.vlgmr.msra.gmra.mrb[80].mxu0 %vm1408_vm2, %v2297_v44  ;;  %3599 = vmatprep.subr.bf16.mxu1 %v3773_v1 }
 0x403   :  { %v2152_v18 = vpop.f32.mrb[72].mxu0  ;;  %3550 = vmatpush3.bf16.msra.mxu0 %v2409_v14  ;;  %3551 = vmatprep.mubr.msk.bf16.mxu0 %vm3774_vm0, %v3773_v1  ;;  %v3159_v17 = vld [vmem:[%s4509_s8] ss:$0 sm:$0xff] }
 0x404   :  { %v3517_v19 = vpop.f32.mrb[73].mxu0  ;;  %3555 = vmatprep.subr.bf16.mxu0 %v3773_v1  ;;  %v2300_v45 = vpack.c.bf16 %v2152_v18, %v2152_v18 }
 0x405   :  { %v2155_v20 = vpop.f32.mrb[74].mxu0  ;;  %3600 = vmatpush3.bf16.msra.mxu1 %v3698_v8  ;;  %v3160_v19 = vld [vmem:[%s4510_s9] ss:$0 sm:$0xff] }
 0x406   :  { %v3518_v21 = vpop.f32.mrb[75].mxu0  ;;  %3601 = vmatprep.subr.bf16.mxu1 %v3773_v1 }
 0x407   :  { %v2198_v52 = vpop.f32.mrb[72].mxu1 }
 0x408   :  { %v3523_v22 = vpop.f32.mrb[73].mxu1  ;;  %v2301_v62 = vpack.c.bf16 %v2198_v52, %v2198_v52  ;;  %v3702_v52 = vld [vmem:[%s4515_s14] sm:$0xff]  }
 0x409   :  { %v2201_v23 = vpop.f32.mrb[74].mxu1  ;;  %3602 = vmatpush3.bf16.msra.mxu1 %v3699_v9 }
 0x40a   :  { %v3524_v25 = vpop.f32.mrb[75].mxu1  ;;  %3603 = vmatprep.subr.bf16.mxu1 %v3773_v1  ;;  %v3703_v23 = vld [vmem:[%s4515_s14 + $0x8] sm:$0xff]  }
 0x40b   :  { %v2244_v27 = vpop.f32.mrb[76].mxu0  ;;  %v3705_v25 = vld [vmem:[%s4515_s14 + $0x18] sm:$0xff]  }
 0x40c   :  { %v3529_v30 = vpop.f32.mrb[77].mxu0  ;;  %v2302_v40 = vpack.c.bf16 %v2244_v27, %v2244_v27  ;;  %v3706_v27 = vld [vmem:[%s4515_s14 + $0x20] sm:$0xff]  }
 0x40d   :  { %v2247_v28 = vpop.f32.mrb[78].mxu0  ;;  %3604 = vmatpush3.bf16.msra.mxu1 %v3700_v10  ;;  %v3708_v30 = vld [vmem:[%s4515_s14 + $0x30] sm:$0xff]  }
 0x40e   :  { %v3530_v32 = vpop.f32.mrb[79].mxu0  ;;  %3552 = vmatmul.mubr.msk.bf16.vlgmr.msra.gmra.mrb[80].mxu0 %vm1408_vm2, %v2298_v29  ;;  %3605 = vmatprep.subr.bf16.mxu1 %v3773_v1  ;;  %v3707_v29 = vld [vmem:[%s4515_s14 + $0x28] sm:$0xff]   ;;  %v3161_v28 = vld [vmem:[%s4514_s13] ss:$0 sm:$0xff] }
 0x40f   :  { %v2290_v33 = vpop.f32.mrb[76].mxu1  ;;  %3556 = vmatpush3.bf16.msra.mxu0 %v2455_v31  ;;  %3557 = vmatprep.mubr.msk.bf16.mxu0 %vm3774_vm0, %v3773_v1  ;;  %v3709_v31 = vld [vmem:[%s4515_s14 + $0x38] sm:$0xff]  }
 0x410   :  { %v3535_v35 = vpop.f32.mrb[77].mxu1  ;;  %3561 = vmatprep.subr.bf16.mxu0 %v3773_v1  ;;  %v2303_v51 = vpack.c.bf16 %v2290_v33, %v2290_v33 }
 0x411   :  { %v2293_v26 = vpop.f32.mrb[78].mxu1  ;;  %3606 = vmatpush3.bf16.msra.mxu1 %v3701_v12 }
 0x412   :  { %v3536_v38 = vpop.f32.mrb[79].mxu1  ;;  %3611 = vmatprep.subr.bf16.mxu1 %v3773_v1 }
 0x41a   :  { %3558 = vmatmul.mubr.msk.bf16.vlgmr.msra.gmra.mrb[80].mxu0 %vm1408_vm2, %v2299_v41 }
 0x41b   :  { %3562 = vmatpush3.bf16.msra.mxu0 %v2501_v47  ;;  %3563 = vmatprep.mubr.msk.bf16.mxu0 %vm3774_vm0, %v3773_v1 }
 0x41c   :  { %3567 = vmatprep.subr.bf16.mxu0 %v3773_v1 }
 0x426   :  { %3564 = vmatmul.mubr.msk.bf16.vlgmr.msra.gmra.mrb[80].mxu0 %vm1408_vm2, %v2300_v45 }
 0x427   :  { %3568 = vmatpush3.bf16.msra.mxu0 %v2547_v46  ;;  %3569 = vmatprep.mubr.msk.bf16.mxu0 %vm3774_vm0, %v3773_v1  ;;  %v3170_v46 = vld [vmem:[%s4516_s15] ss:$0 sm:$0xff] }
 0x428   :  { %3573 = vmatprep.subr.bf16.mxu0 %v3773_v1 }
 0x432   :  { %3570 = vmatmul.mubr.msk.bf16.vlgmr.msra.gmra.mrb[80].mxu0 %vm1408_vm2, %v2301_v62 }
 0x433   :  { %3574 = vmatpush3.bf16.msra.mxu0 %v2593_v34  ;;  %3575 = vmatprep.mubr.msk.bf16.mxu0 %vm3774_vm0, %v3773_v1 }
 0x434   :  { %3579 = vmatprep.subr.bf16.mxu0 %v3773_v1 }
 0x43e   :  { %3576 = vmatmul.mubr.msk.bf16.vlgmr.msra.gmra.mrb[80].mxu0 %vm1408_vm2, %v2302_v40 }
 0x43f   :  { %3580 = vmatpush3.bf16.msra.mxu0 %v2639_v49  ;;  %3581 = vmatprep.mubr.msk.bf16.mxu0 %vm3774_vm0, %v3773_v1 }
 0x440   :  { %3585 = vmatprep.subr.bf16.mxu0 %v3773_v1 }
 0x44a   :  { %3582 = vmatmul.mubr.msk.bf16.vlgmr.msra.gmra.mrb[80].mxu0 %vm1408_vm2, %v2303_v51 }
 0x44b   :  { %3586 = vmatpush3.bf16.msra.mxu0 %v3693_v0  ;;  %3587 = vmatprep.mubr.msk.bf16.mxu0 %vm3774_vm0, %v3773_v1 }
 0x456   :  { %3588 = vmatmul.mubr.msk.bf16.vlgmr.msra.gmra.mrb[80].mxu0 %vm282_vm1, %v3748_v53  ;;  %vm2753_vm1 = vcmp.lt.s32.totalorder %v2752_v61, 32 }
 0x457   :  { %v4410_v3 = vsel %vm2753_vm1, 1.0, %v3773_v1 }
 0x529   :  { %v2745_v15 = vpop.f32.mrb[80].mxu0 }
 0x52a   :  { %v3632_v55 = vadd.f32 %v3631_v36, %v2745_v15  ;;  %v3589_v56 = vpop.f32.mrb[81].mxu0 }
 0x52b   :  { %v2748_v57 = vpop.f32.mrb[82].mxu0 }
 0x52c   :  { %2759 = vadd.xlane.f32.xlu0 %v3632_v55  ;;  %v3590_v50 = vpop.f32.mrb[83].mxu0  ;;  %v3179_v57 = vld [vmem:[%s4511_s10] ss:$0 sm:$0xff] }
 0x5b9   :  { %v2760_v63 = vpop.xlane.xlu0 %2759 }
 0x5ba   :  { %v2761_v2 = vmul.f32 0.03125, %v2760_v63 }
 0x5bc   :  { %v2762_v4 = vsub.f32 %v3632_v55, %v2761_v2 }
 0x5be   :  { %v2763_v42 = vmul.f32 %v4410_v3, %v2762_v4 }
 0x5c0   :  { %v2764_v5 = vmul.f32 %v2763_v42, %v2763_v42 }
 0x5c2   :  { %2765 = vadd.xlane.f32.xlu1 %v2764_v5 }
 0x64f   :  { %v2766_v44 = vpop.xlane.xlu1 %2765 }
 0x650   :  { %v2767_v13 = vmul.f32 0.03125, %v2766_v44 }
 0x652   :  { %v2768_v14 = vadd.f32 1e-05, %v2767_v13 }
 0x654   :  { %3742 = vrsqrt.f32 %v2768_v14 }
 0x65e   :  { %v3743_v16 = vpop.eup %3742 }
 0x65f   :  { %v2770_v18 = vmul.f32 %v3743_v16, %v2763_v42 }
 0x661   :  { %v2777_v20 = vmul.f32 %v3159_v17, %v2770_v18 }
 0x663   :  { %v2784_v21 = vadd.f32 %v3160_v19, %v2777_v20 }
 0x665   :  { %v2785_v22 = vpack.c.bf16 %v2784_v21, %v2784_v21 }
 0x667   :  { %3608 = vmatmul.mubr.bf16.vlgmr.msra.gmra.mrb[80].mxu1 %v2785_v22 }
 0x668   :  { %3612 = vmatpush3.bf16.msra.mxu1 %v3702_v52  ;;  %3627 = vmatprep.mubr.msk.bf16.mxu1 %vm3774_vm0, %v3773_v1 }
 0x669   :  { %3613 = vmatprep.subr.bf16.mxu1 %v3773_v1 }
 0x66c   :  { %3614 = vmatpush3.bf16.msra.mxu1 %v3703_v23 }
 0x66d   :  { %3615 = vmatprep.subr.bf16.mxu1 %v3773_v1 }
 0x670   :  { %3616 = vmatpush3.bf16.msra.mxu1 %v3704_v24 }
 0x671   :  { %3617 = vmatprep.subr.bf16.mxu1 %v3773_v1 }
 0x674   :  { %3618 = vmatpush3.bf16.msra.mxu1 %v3705_v25 }
 0x675   :  { %3619 = vmatprep.subr.bf16.mxu1 %v3773_v1 }
 0x678   :  { %3620 = vmatpush3.bf16.msra.mxu1 %v3706_v27 }
 0x679   :  { %3621 = vmatprep.subr.bf16.mxu1 %v3773_v1 }
 0x67c   :  { %3622 = vmatpush3.bf16.msra.mxu1 %v3707_v29 }
 0x67d   :  { %3623 = vmatprep.subr.bf16.mxu1 %v3773_v1 }
 0x680   :  { %3624 = vmatpush3.bf16.msra.mxu1 %v3708_v30 }
 0x681   :  { %3625 = vmatprep.subr.bf16.mxu1 %v3773_v1 }
 0x684   :  { %3626 = vmatpush3.bf16.msra.mxu1 %v3709_v31 }
 0x73a   :  { %v2891_v32 = vpop.f32.mrb[80].mxu1 }
 0x73b   :  { %v2892_v33 = vadd.f32 %v3161_v28, %v2891_v32  ;;  %v3609_v35 = vpop.f32.mrb[81].mxu1 }
 0x73c   :  { %v2894_v26 = vpop.f32.mrb[82].mxu1 }
 0x73d   :  { %v2898_v38 = vmul.f32 0.70710677, %v2892_v33  ;;  %v3610_v39 = vpop.f32.mrb[83].mxu1  ;;  %v2897_v47 = vmul.f32 0.5, %v2892_v33 }
 0x73f   :  { %3744 = verf.f32 %v2898_v38 }
 0x749   :  { %v3745_v41 = vpop.eup %3744 }
 0x74a   :  { %v2900_v43 = vadd.f32 1.0, %v3745_v41 }
 0x74c   :  { %v2901_v1 = vmul.f32 %v2900_v43, %v2897_v47 }
 0x74e   :  { %v2902_v45 = vpack.c.bf16 %v2901_v1, %v2901_v1 }
 0x750   :  { %3628 = vmatmul.mubr.bf16.vlgmr.msra.gmra.mrb[84].mxu1 %v2902_v45 }
 0x823   :  { %v3008_v37 = vpop.f32.mrb[84].mxu1 }
 0x824   :  { %v3009_v62 = vadd.f32 %v3170_v46, %v3008_v37  ;;  %v3629_v34 = vpop.f32.mrb[85].mxu1 }
 0x825   :  { %v3011_v48 = vpop.f32.mrb[86].mxu1 }
 0x826   :  { %v3630_v40 = vpop.f32.mrb[87].mxu1  ;;  %v3014_v49 = vadd.f32 %v3009_v62, %v2784_v21 }
 0x828   :  { %3017 = vadd.xlane.f32.xlu0 %v3014_v49 }
 0x8b5   :  { %v3018_v0 = vpop.xlane.xlu0 %3017 }
 0x8b6   :  { %v3019_v51 = vmul.f32 0.03125, %v3018_v0 }
 0x8b8   :  { %v3020_v53 = vsub.f32 %v3014_v49, %v3019_v51 }
 0x8ba   :  { %v3021_v11 = vmul.f32 %v4410_v3, %v3020_v53 }
 0x8bc   :  { %v3022_v54 = vmul.f32 %v3021_v11, %v3021_v11 }
 0x8be   :  { %3023 = vadd.xlane.f32.xlu1 %v3022_v54 }
 0x94b   :  { %v3024_v36 = vpop.xlane.xlu1 %3023 }
 0x94c   :  { %v3025_v15 = vmul.f32 0.03125, %v3024_v36 }
 0x94e   :  { %v3026_v55 = vadd.f32 1e-05, %v3025_v15 }
 0x950   :  { %3746 = vrsqrt.f32 %v3026_v55 }
 0x95a   :  { %v3747_v56 = vpop.eup %3746 }
 0x95b   :  { %v3028_v50 = vmul.f32 %v3747_v56, %v3021_v11 }
 0x95d   :  { %v3035_v59 = vmul.f32 %v3179_v57, %v3028_v50 }
 0x95f   :  { %v3042_v60 = vadd.f32 %v3180_v58, %v3035_v59 }
 0x961   :  { %3043 = vst [vmem:[#allocation2] sm:$0xff] %v3042_v60 }
 0x962   :  { %3760 = shalt.err (!%p3757_p4)
}
 0x963   :  { %s3761_s12 = scalar_lea.hbm %s4517_s16, 128 }
 0x964   :  { %p3762_p5 = scmp.ne.s32.totalorder %s4517_s16, %s3761_s12  ;;  %p3765_p6 = scmp.lt.u32.totalorder %s3761_s12, %s4517_s16 }
 0x966   :  { %p3767_p7 = pnand %p3765_p6, %p3762_p5 }
 0x968   :  { %3770 = shalt.err (!%p3767_p7)
}
 0x969   :  { %3053 = dma.vmem_to_hbm [thread:$0]  %s3051_s3, 128, %s4517_s16, [#allocation3]  }
 0x96a   :  { %3771 = dma.done.wait [#allocation3], 128  }
 0x96b   :  { %3772 = vsyncadd [#allocation3], 4294967168 }
 0x96c   :  { %3057 = vsyncpa [#allocation3], 1 }

</bundles_post_ra>
